<compile_context>
chip_gen: v7x
topology: tpu7x:2x2x1
jax: 0.10.0
libtpu: 0.0.40
codegen_flags: <defaults>
</compile_context>

<pallas_src>
import functools

import jax
import jax.numpy as jnp
from jax.experimental import pallas as pl
from jax.experimental.pallas import tpu as pltpu


def _round_up(x, m):
    return ((x + m - 1) // m) * m


# --------------------------------------------------------------------------- kernel
def segrnn_fused_kernel(x_ref, chan_ref, w_emb_ref, b_emb_ref,
                        w_ih_ref, w_hh_ref, b_rz_ref, b_in_ref, b_hn_ref,
                        pos_gate_ref, w_pred_ref, b_pred_ref, y_ref):
    """Fused SegRNN forward for one tile of B*C rows.

    x_ref       : (TM, seg_num_x*seg_len) f32  left-padded, seq_last-subtracted series
    chan_ref    : (TM, 3*Dp)              f32  per-row channel gate contribution
    w_emb_ref   : (seg_len, Dp) bf16   b_emb_ref: (1, Dp) f32
    w_ih_ref    : (Dp, 3*Dp) bf16 [r|z|n]   w_hh_ref: (Dp, 3*Dp) bf16
    b_rz_ref    : (1, 2*Dp) f32 (pre-summed b_ih+b_hh)   b_in/b_hn: (1, Dp) f32
    pos_gate_ref: (seg_num_y, 3*Dp) f32  = pos_emb @ W_ih[:D/2]
    w_pred_ref  : (Dp, seg_len) bf16   b_pred_ref: (1, seg_len) f32
    y_ref       : (TM, out_w_pad) f32  lane-dense padded output segments
    """
    rows = x_ref.shape[0]
    seg_len, d = w_emb_ref.shape                 # d == Dp (lane-padded d_model)
    seg_num_x = x_ref.shape[1] // seg_len
    seg_num_y = pos_gate_ref.shape[0]
    out_w_pad = y_ref.shape[1]
    f32, bf16 = jnp.float32, jnp.bfloat16

    w_emb = w_emb_ref[...]                       # bf16 (seg_len, Dp)
    w_ih = w_ih_ref[...]                         # bf16 (Dp, 3Dp)
    w_hh = w_hh_ref[...]                         # bf16 (Dp, 3Dp)
    w_pred = w_pred_ref[...]                     # bf16 (Dp, seg_len)

    # (1, .) biases are used directly: Mosaic does the sublane-broadcast add,
    # no need to pin (rows, .) materialized broadcasts in VMEM.
    b_emb = b_emb_ref[...]
    b_rz = b_rz_ref[...]
    b_in = b_in_ref[...]
    b_hn = b_hn_ref[...]
    b_pred = b_pred_ref[...]

    def gru_step(gi, gh, h):
        # gi, gh: (rows, 3Dp) pre-bias gate pre-activations (PyTorch nn.GRU math).
        rz = jax.nn.sigmoid(gi[:, :2 * d] + gh[:, :2 * d] + b_rz)
        r = rz[:, :d]
        z = rz[:, d:]
        n = jnp.tanh(gi[:, 2 * d:] + b_in + r * (gh[:, 2 * d:] + b_hn))
        return (1.0 - z) * n + z * h

    # ------------- encoder: valueEmbedding + GRU over seg_num_x input segments
    # TODO(synk): for very large seg_num_x (>~32) switch the static unroll to a
    # two-phase lax.fori_loop (precompute gi_t for all t, then a serial h-only
    # recurrence) to bound vreg live ranges.
    h = jnp.zeros((rows, d), f32)
    for t in range(seg_num_x):
        x_t = x_ref[:, t * seg_len:(t + 1) * seg_len].astype(bf16)
        emb = jnp.maximum(
            jnp.dot(x_t, w_emb, preferred_element_type=f32) + b_emb, 0.0)
        gi = jnp.dot(emb.astype(bf16), w_ih, preferred_element_type=f32)
        gh = jnp.dot(h.astype(bf16), w_hh, preferred_element_type=f32)
        h = gru_step(gi, gh, h)

    # ------------- decoder: one GRU step per output segment, all from the same h
    gh_dec = jnp.dot(h.astype(bf16), w_hh, preferred_element_type=f32)  # shared over j
    chan_gate = chan_ref[...]                                           # (rows, 3Dp)
    pos_gate = pos_gate_ref[...]                                        # (sy, 3Dp)

    # shared pre-activations hoisted out of the per-segment loop
    base_rz = chan_gate[:, :2 * d] + gh_dec[:, :2 * d] + b_rz           # (rows, 2Dp)
    base_ni = chan_gate[:, 2 * d:] + b_in                               # (rows, Dp)
    base_nh = gh_dec[:, 2 * d:] + b_hn                                  # (rows, Dp)

    ys = []
    for j in range(seg_num_y):
        rz = jax.nn.sigmoid(base_rz + pos_gate[j:j + 1, :2 * d])
        r = rz[:, :d]
        z = rz[:, d:]
        n = jnp.tanh(base_ni + pos_gate[j:j + 1, 2 * d:] + r * base_nh)
        hy = (1.0 - z) * n + z * h
        # predict = Dropout (identity in eval) + Linear(D -> seg_len)
        ys.append(jnp.dot(hy.astype(bf16), w_pred,
                          preferred_element_type=f32) + b_pred)
    out_w = seg_num_y * seg_len
    if out_w_pad > out_w:
        ys.append(jnp.zeros((rows, out_w_pad - out_w), f32))
    y_ref[...] = jnp.concatenate(ys, axis=-1)                           # one dense store


# --------------------------------------------------------------------------- tiling
def _chip_limits():
    """(row-tile cap, scoped-VMEM budget) — generation aware, safe fallback."""
    try:
        vmem_cap = int(pltpu.get_tpu_info().vmem_capacity_bytes)
    except Exception:  # noqa: BLE001 - best-effort HW query
        vmem_cap = 64 << 20
    if vmem_cap >= (128 << 20):          # v5e / v6e
        return 512, 96 << 20
    return 256, 48 << 20                 # v7x (64 MiB) or unknown


def _pick_tm(n1, tm_cap):
    # >= ~4 grid steps (2 per TensorCore on v7x) with bounded padding waste.
    tm = _round_up(max(8, -(-n1 // 4)), 8)
    return min(tm, tm_cap)


# --------------------------------------------------------------------------- wrapper
def _fused_call(x2d, chan_rows, kp, cfg, *, tm, dp, out_w_pad, vmem_budget):
    n1p, lpad = x2d.shape
    seg_len = cfg["seg_len"]
    sx = cfg["seg_num_x"]
    sy = cfg["seg_num_y"]

    row_spec = lambda w: pl.BlockSpec((tm, w), lambda i: (i, 0))
    # Constants: whole array resident in VMEM once (no per-step double buffer).
    vmem_full = pl.BlockSpec(memory_space=pltpu.MemorySpace.VMEM)

    consts = (kp["w_emb"], kp["b_emb"], kp["w_ih"], kp["w_hh"], kp["b_rz"],
              kp["b_in"], kp["b_hn"], kp["pos_gate"], kp["w_pred"], kp["b_pred"])

    flops = 2 * n1p * (sx * (seg_len * dp + 2 * dp * 3 * dp)
                       + dp * 3 * dp + sy * dp * seg_len)
    transcendentals = n1p * (sx + sy) * 3 * dp
    bytes_accessed = (x2d.size * 4 + chan_rows.size * 4 + n1p * out_w_pad * 4
                      + sum(int(c.size) * c.dtype.itemsize for c in consts))

    # Explicit scoped-VMEM budget: double-buffered row tiles + single-buffered
    # constants + a generous allowance for in-kernel temporaries.
    vmem_need = (2 * tm * lpad * 4 + 2 * tm * 3 * dp * 4 + 2 * tm * out_w_pad * 4
                 + (seg_len * dp + 2 * dp * 3 * dp + dp * seg_len) * 2
                 + (sy * 3 * dp + 5 * dp + seg_len) * 4
                 + tm * (8 * 3 * dp + 4 * dp + out_w_pad) * 4)
    vmem_limit = int(min(max(vmem_need + (4 << 20), 16 << 20), vmem_budget))

    return pl.pallas_call(
        segrnn_fused_kernel,
        out_shape=jax.ShapeDtypeStruct((n1p, out_w_pad), jnp.float32),
        grid=(n1p // tm,),
        in_specs=[row_spec(lpad), row_spec(3 * dp)] + [vmem_full] * 10,
        out_specs=row_spec(out_w_pad),
        compiler_params=pltpu.CompilerParams(
            dimension_semantics=("parallel",),        # megacore split on v7x
            vmem_limit_bytes=vmem_limit),
        cost_estimate=pl.CostEstimate(flops=flops,
                                      transcendentals=transcendentals,
                                      bytes_accessed=bytes_accessed),
    )(x2d, chan_rows, *consts)


def _pack_params(p, d, dp):
    """torch-layout f32 params -> lane-padded, gate-concatenated kernel params."""
    f32, bf16 = jnp.float32, jnp.bfloat16
    pad = dp - d

    def pad_gate_cols(w_t):      # (d, 3d) -> (dp, 3dp), gates at [0:d],[dp:dp+d],...
        blocks = [jnp.pad(w_t[:, g * d:(g + 1) * d], ((0, pad), (0, pad)))
                  for g in range(3)]
        return jnp.concatenate(blocks, axis=1)

    def pad_gate_vec(v, ng):     # (ng*d,) -> (1, ng*dp)
        blocks = [jnp.pad(v[g * d:(g + 1) * d], (0, pad)) for g in range(ng)]
        return jnp.concatenate(blocks)[None, :]

    w_ih_t = pad_gate_cols(p["w_ih"].T)                       # (Dp, 3Dp)
    w_hh_t = pad_gate_cols(p["w_hh"].T)                       # (Dp, 3Dp)

    # decoder input contributions (exact, f32):
    #   pe = [pos_emb[j] | channel_emb[c]]  =>  pe @ W_ih^T splits at D/2
    pos_gate = jnp.dot(p["pos_emb"], w_ih_t[: d // 2, :])     # (sy, 3Dp)
    chan_gate = jnp.dot(p["channel_emb"], w_ih_t[d // 2: d, :])  # (enc_in, 3Dp)

    return {
        "w_emb": jnp.pad(p["w_emb"].T, ((0, 0), (0, pad))).astype(bf16),   # (sl, Dp)
        "b_emb": jnp.pad(p["b_emb"], (0, pad))[None, :].astype(f32),        # (1, Dp)
        "w_ih": w_ih_t.astype(bf16),
        "w_hh": w_hh_t.astype(bf16),
        "b_rz": pad_gate_vec(p["b_ih"][:2 * d] + p["b_hh"][:2 * d], 2).astype(f32),
        "b_in": pad_gate_vec(p["b_ih"][2 * d:], 1).astype(f32),
        "b_hn": pad_gate_vec(p["b_hh"][2 * d:], 1).astype(f32),
        "pos_gate": pos_gate.astype(f32),
        "chan_gate": chan_gate.astype(f32),
        "w_pred": jnp.pad(p["w_pred"].T, ((0, pad), (0, 0))).astype(bf16),  # (Dp, sl)
        "b_pred": p["b_pred"][None, :].astype(f32),
    }


@functools.partial(jax.jit, static_argnames=("cfg",))
def segrnn_forward(x_enc, params, cfg):
    cfg = dict(cfg)
    B, L, C = x_enc.shape
    seg_len = cfg["seg_len"]
    sx = cfg["seg_num_x"]
    sy = cfg["seg_num_y"]
    d = cfg["d_model"]
    pred_len = cfg["pred_len"]            # == seq_len in this module
    assert d % 2 == 0, "d_model must be even (pos/channel embedding split)"
    dp = _round_up(d, 128)                # lane-align gate slices (exact zero-padding)

    # normalize by last step
    seq_last = x_enc[:, -1:, :]                               # (B, 1, C)
    x = (x_enc - seq_last).transpose(0, 2, 1)                 # (B, C, L)
    lpad = sx * seg_len
    if lpad > L:                                              # ConstantPad1d((pad,0),0)
        x = jnp.pad(x, ((0, 0), (0, 0), (lpad - L, 0)))
    x2d = x.reshape(B * C, lpad).astype(jnp.float32)          # segments sliced in-kernel

    kp = _pack_params(params, d, dp)
    # per-row decoder channel-gate contribution (tiny (B*C, 3Dp) table)
    chan_rows = jnp.tile(kp["chan_gate"], (B, 1))

    # row-tile grid over B*C independent GRU chains
    n1 = B * C
    tm_cap, vmem_budget = _chip_limits()
    tm = _pick_tm(n1, tm_cap)
    n1p = _round_up(n1, tm)
    if n1p > n1:
        x2d = jnp.pad(x2d, ((0, n1p - n1), (0, 0)))
        chan_rows = jnp.pad(chan_rows, ((0, n1p - n1), (0, 0)))

    out_w = sy * seg_len
    out_w_pad = _round_up(out_w, 128)                         # dense vst stores

    y = _fused_call(x2d, chan_rows, kp, cfg, tm=tm, dp=dp,
                    out_w_pad=out_w_pad, vmem_budget=vmem_budget)
    y = y[:n1, :out_w].reshape(B, C, out_w)
    y = y.transpose(0, 2, 1)[:, -pred_len:, :]                # (B, pred_len, C)
    y = y + seq_last

    # TODO(synk): OutputBlock's definition is not given in the reference; implemented
    # as a pointwise channel Linear(enc_in -> c_out) (dropout = identity).  Left to
    # XLA: K=enc_in, N=c_out are tiny, a Pallas kernel here is pure launch overhead.
    dec = jnp.einsum("btc,co->bto", y, params["w_proj"].T) + params["b_proj"]
    return dec


# --------------------------------------------------------------------------- params
def init_params(key, *, seg_len, d_model, seg_num_y, enc_in, c_out):
    ks = jax.random.split(key, 12)
    s = 0.1
    d = d_model
    return {   # torch-layout parameters
        "w_emb": jax.random.normal(ks[0], (d, seg_len), jnp.float32) * s,   # Linear weight
        "b_emb": jax.random.normal(ks[1], (d,), jnp.float32) * s,
        "w_ih": jax.random.normal(ks[2], (3 * d, d), jnp.float32) * s,      # GRU weight_ih [r|z|n]
        "w_hh": jax.random.normal(ks[3], (3 * d, d), jnp.float32) * s,      # GRU weight_hh [r|z|n]
        "b_ih": jax.random.normal(ks[4], (3 * d,), jnp.float32) * s,
        "b_hh": jax.random.normal(ks[5], (3 * d,), jnp.float32) * s,
        "pos_emb": jax.random.normal(ks[6], (seg_num_y, d // 2), jnp.float32),
        "channel_emb": jax.random.normal(ks[7], (enc_in, d // 2), jnp.float32),
        "w_pred": jax.random.normal(ks[8], (seg_len, d), jnp.float32) * s,
        "b_pred": jax.random.normal(ks[9], (seg_len,), jnp.float32) * s,
        "w_proj": jax.random.normal(ks[10], (c_out, enc_in), jnp.float32) * s,
        "b_proj": jax.random.normal(ks[11], (c_out,), jnp.float32) * s,
    }


# --------------------------------------------------------------------------- reference
def _segrnn_reference(x_enc, p, cfg):
    """Pure-JAX (XLA, f32) reference implementing the PyTorch module's math."""
    cfg = dict(cfg)
    B, L, C = x_enc.shape
    sl, sx, sy = cfg["seg_len"], cfg["seg_num_x"], cfg["seg_num_y"]
    d, pred_len = cfg["d_model"], cfg["pred_len"]

    seq_last = x_enc[:, -1:, :]
    x = (x_enc - seq_last).transpose(0, 2, 1)
    lpad = sx * sl
    if lpad > L:
        x = jnp.pad(x, ((0, 0), (0, 0), (lpad - L, 0)))
    xseg = x.reshape(B * C, sx, sl)

    w_ih, w_hh, b_ih, b_hh = p["w_ih"], p["w_hh"], p["b_ih"], p["b_hh"]

    def gru(x_t, h):
        gi = x_t @ w_ih.T + b_ih
        gh = h @ w_hh.T + b_hh
        r = jax.nn.sigmoid(gi[:, :d] + gh[:, :d])
        z = jax.nn.sigmoid(gi[:, d:2 * d] + gh[:, d:2 * d])
        n = jnp.tanh(gi[:, 2 * d:] + r * gh[:, 2 * d:])
        return (1.0 - z) * n + z * h

    h = jnp.zeros((B * C, d), jnp.float32)
    for t in range(sx):
        emb = jnp.maximum(xseg[:, t] @ p["w_emb"].T + p["b_emb"], 0.0)
        h = gru(emb, h)

    pe = jnp.concatenate(
        [jnp.tile(p["pos_emb"][None, :, :], (C, 1, 1)),
         jnp.tile(p["channel_emb"][:, None, :], (1, sy, 1))], axis=-1
    ).reshape(C * sy, d)
    pe = jnp.tile(pe, (B, 1))
    h0 = jnp.repeat(h, sy, axis=0)
    hy = gru(pe, h0)
    y = hy @ p["w_pred"].T + p["b_pred"]
    y = y.reshape(B, C, sy * sl).transpose(0, 2, 1)[:, -pred_len:, :] + seq_last
    return jnp.einsum("btc,co->bto", y, p["w_proj"].T) + p["b_proj"]


# --------------------------------------------------------------------------- main
if __name__ == "__main__":
    # small config consistent with the module
    B, seq_len, enc_in = 2, 16, 4
    seg_len, d_model, c_out = 4, 32, 2
    seg_num_x = -(-seq_len // seg_len)        # 4
    pred_len = seq_len                        # module sets pred_len = seq_len
    seg_num_y = -(-pred_len // seg_len)       # 4

    cfg = dict(seg_len=seg_len, d_model=d_model, seg_num_x=seg_num_x,
               seg_num_y=seg_num_y, pred_len=pred_len, c_out=c_out)
    cfg = tuple(sorted(cfg.items()))          # hashable for jit static arg

    key = jax.random.PRNGKey(0)
    kx, kp = jax.random.split(key)
    x_enc = jax.random.normal(kx, (B, seq_len, enc_in), jnp.float32)
    params = init_params(kp, seg_len=seg_len, d_model=d_model,
                         seg_num_y=seg_num_y, enc_in=enc_in, c_out=c_out)

    out = jax.block_until_ready(segrnn_forward(x_enc, params, cfg))
    assert out.shape == (B, pred_len, c_out), out.shape
    assert bool(jnp.all(jnp.isfinite(out)))

    ref = _segrnn_reference(x_enc, params, cfg)
    max_err = float(jnp.max(jnp.abs(out - ref)))
    assert max_err < 3e-2, f"mismatch vs pure-JAX reference: {max_err}"

    print("KERNEL_OK")
</pallas_src>

<mosaic_0001>
module attributes {stable_mosaic.version = 11 : i64} {
  func.func @segrnn_fused_kernel(%arg0: i32, %arg1: memref<8x16xf32, #tpu.memory_space<vmem>>, %arg2: memref<8x384xf32, #tpu.memory_space<vmem>>, %arg3: memref<4x128xbf16, #tpu.memory_space<vmem>>, %arg4: memref<1x128xf32, #tpu.memory_space<vmem>>, %arg5: memref<128x384xbf16, #tpu.memory_space<vmem>>, %arg6: memref<128x384xbf16, #tpu.memory_space<vmem>>, %arg7: memref<1x256xf32, #tpu.memory_space<vmem>>, %arg8: memref<1x128xf32, #tpu.memory_space<vmem>>, %arg9: memref<1x128xf32, #tpu.memory_space<vmem>>, %arg10: memref<4x384xf32, #tpu.memory_space<vmem>>, %arg11: memref<128x4xbf16, #tpu.memory_space<vmem>>, %arg12: memref<1x4xf32, #tpu.memory_space<vmem>>, %arg13: memref<8x128xf32, #tpu.memory_space<vmem>>) attributes {dimension_semantics = [#tpu.dimension_semantics<parallel>], iteration_bounds = array<i64: 1>, scalar_prefetch = 0 : i64, scratch_operands = 0 : i64, tpu.core_type = #tpu.core_type<tc>, window_params = [{transform_indices = @transform_0, window_bounds = array<i64: 8, 16>}, {transform_indices = @transform_1, window_bounds = array<i64: 8, 384>}, {pipeline_mode = #tpu.pipeline_mode<synchronous>, transform_indices = @transform_2, window_bounds = array<i64: 4, 128>}, {pipeline_mode = #tpu.pipeline_mode<synchronous>, transform_indices = @transform_3, window_bounds = array<i64: 1, 128>}, {pipeline_mode = #tpu.pipeline_mode<synchronous>, transform_indices = @transform_4, window_bounds = array<i64: 128, 384>}, {pipeline_mode = #tpu.pipeline_mode<synchronous>, transform_indices = @transform_5, window_bounds = array<i64: 128, 384>}, {pipeline_mode = #tpu.pipeline_mode<synchronous>, transform_indices = @transform_6, window_bounds = array<i64: 1, 256>}, {pipeline_mode = #tpu.pipeline_mode<synchronous>, transform_indices = @transform_7, window_bounds = array<i64: 1, 128>}, {pipeline_mode = #tpu.pipeline_mode<synchronous>, transform_indices = @transform_8, window_bounds = array<i64: 1, 128>}, {pipeline_mode = #tpu.pipeline_mode<synchronous>, transform_indices = @transform_9, window_bounds = array<i64: 4, 384>}, {pipeline_mode = #tpu.pipeline_mode<synchronous>, transform_indices = @transform_10, window_bounds = array<i64: 128, 4>}, {pipeline_mode = #tpu.pipeline_mode<synchronous>, transform_indices = @transform_11, window_bounds = array<i64: 1, 4>}, {transform_indices = @transform_12, window_bounds = array<i64: 8, 128>}]} {
    %c0 = arith.constant 0 : index
    %c0_0 = arith.constant 0 : index
    %0 = vector.load %arg3[%c0, %c0_0] : memref<4x128xbf16, #tpu.memory_space<vmem>>, vector<4x128xbf16>
    %c0_1 = arith.constant 0 : index
    %c0_2 = arith.constant 0 : index
    %1 = vector.load %arg5[%c0_1, %c0_2] : memref<128x384xbf16, #tpu.memory_space<vmem>>, vector<128x384xbf16>
    %c0_3 = arith.constant 0 : index
    %c0_4 = arith.constant 0 : index
    %2 = vector.load %arg6[%c0_3, %c0_4] : memref<128x384xbf16, #tpu.memory_space<vmem>>, vector<128x384xbf16>
    %c0_5 = arith.constant 0 : index
    %c0_6 = arith.constant 0 : index
    %3 = vector.load %arg11[%c0_5, %c0_6] : memref<128x4xbf16, #tpu.memory_space<vmem>>, vector<128x4xbf16>
    %c0_7 = arith.constant 0 : index
    %c0_8 = arith.constant 0 : index
    %4 = vector.load %arg4[%c0_7, %c0_8] : memref<1x128xf32, #tpu.memory_space<vmem>>, vector<1x128xf32>
    %c0_9 = arith.constant 0 : index
    %c0_10 = arith.constant 0 : index
    %5 = vector.load %arg7[%c0_9, %c0_10] : memref<1x256xf32, #tpu.memory_space<vmem>>, vector<1x256xf32>
    %c0_11 = arith.constant 0 : index
    %c0_12 = arith.constant 0 : index
    %6 = vector.load %arg8[%c0_11, %c0_12] : memref<1x128xf32, #tpu.memory_space<vmem>>, vector<1x128xf32>
    %c0_13 = arith.constant 0 : index
    %c0_14 = arith.constant 0 : index
    %7 = vector.load %arg9[%c0_13, %c0_14] : memref<1x128xf32, #tpu.memory_space<vmem>>, vector<1x128xf32>
    %c0_15 = arith.constant 0 : index
    %c0_16 = arith.constant 0 : index
    %8 = vector.load %arg12[%c0_15, %c0_16] : memref<1x4xf32, #tpu.memory_space<vmem>>, vector<1x4xf32>
    %cst = arith.constant 0.000000e+00 : f32
    %9 = vector.broadcast %cst : f32 to vector<8x128xf32>
    %c0_17 = arith.constant 0 : index
    %c0_18 = arith.constant 0 : index
    %10 = vector.load %arg1[%c0_17, %c0_18] : memref<8x16xf32, #tpu.memory_space<vmem>>, vector<8x4xf32>
    %11 = arith.truncf %10 : vector<8x4xf32> to vector<8x4xbf16>
    %cst_19 = arith.constant dense<0.000000e+00> : vector<8x128xf32>
    %12 = tpu.matmul %11, %0, %cst_19 {dimension_numbers = #tpu.dot_dimension_numbers<[1], [0], [0], [1], [0, 0, 1, 1], [], []>} : vector<8x4xbf16>, vector<4x128xbf16>, vector<8x128xf32> -> vector<8x128xf32>
    %13 = vector.broadcast %4 : vector<1x128xf32> to vector<8x128xf32>
    %14 = arith.addf %12, %13 : vector<8x128xf32>
    %cst_20 = arith.constant 0.000000e+00 : f32
    %15 = vector.broadcast %cst_20 : f32 to vector<8x128xf32>
    %16 = arith.maximumf %14, %15 : vector<8x128xf32>
    %17 = arith.truncf %16 : vector<8x128xf32> to vector<8x128xbf16>
    %cst_21 = arith.constant dense<0.000000e+00> : vector<8x384xf32>
    %18 = tpu.matmul %17, %1, %cst_21 {dimension_numbers = #tpu.dot_dimension_numbers<[1], [0], [0], [1], [0, 0, 1, 1], [], []>} : vector<8x128xbf16>, vector<128x384xbf16>, vector<8x384xf32> -> vector<8x384xf32>
    %19 = arith.truncf %9 : vector<8x128xf32> to vector<8x128xbf16>
    %cst_22 = arith.constant dense<0.000000e+00> : vector<8x384xf32>
    %20 = tpu.matmul %19, %2, %cst_22 {dimension_numbers = #tpu.dot_dimension_numbers<[1], [0], [0], [1], [0, 0, 1, 1], [], []>} : vector<8x128xbf16>, vector<128x384xbf16>, vector<8x384xf32> -> vector<8x384xf32>
    %21 = vector.extract_strided_slice %18 {offsets = [0, 0], sizes = [8, 256], strides = [1, 1]} : vector<8x384xf32> to vector<8x256xf32>
    %22 = vector.extract_strided_slice %20 {offsets = [0, 0], sizes = [8, 256], strides = [1, 1]} : vector<8x384xf32> to vector<8x256xf32>
    %23 = arith.addf %21, %22 : vector<8x256xf32>
    %24 = vector.broadcast %5 : vector<1x256xf32> to vector<8x256xf32>
    %25 = arith.addf %23, %24 : vector<8x256xf32>
    %26 = arith.negf %25 : vector<8x256xf32>
    %27 = math.exp %26 : vector<8x256xf32>
    %cst_23 = arith.constant 1.000000e+00 : f32
    %28 = vector.broadcast %cst_23 : f32 to vector<8x256xf32>
    %29 = arith.addf %28, %27 : vector<8x256xf32>
    %30 = arith.divf %28, %29 : vector<8x256xf32>
    %31 = vector.extract_strided_slice %30 {offsets = [0, 0], sizes = [8, 128], strides = [1, 1]} : vector<8x256xf32> to vector<8x128xf32>
    %32 = vector.extract_strided_slice %30 {offsets = [0, 128], sizes = [8, 128], strides = [1, 1]} : vector<8x256xf32> to vector<8x128xf32>
    %33 = vector.extract_strided_slice %18 {offsets = [0, 256], sizes = [8, 128], strides = [1, 1]} : vector<8x384xf32> to vector<8x128xf32>
    %34 = vector.broadcast %6 : vector<1x128xf32> to vector<8x128xf32>
    %35 = arith.addf %33, %34 : vector<8x128xf32>
    %36 = vector.extract_strided_slice %20 {offsets = [0, 256], sizes = [8, 128], strides = [1, 1]} : vector<8x384xf32> to vector<8x128xf32>
    %37 = vector.broadcast %7 : vector<1x128xf32> to vector<8x128xf32>
    %38 = arith.addf %36, %37 : vector<8x128xf32>
    %39 = arith.mulf %31, %38 : vector<8x128xf32>
    %40 = arith.addf %35, %39 : vector<8x128xf32>
    %41 = math.tanh %40 : vector<8x128xf32>
    %cst_24 = arith.constant 1.000000e+00 : f32
    %42 = vector.broadcast %cst_24 : f32 to vector<8x128xf32>
    %43 = arith.subf %42, %32 : vector<8x128xf32>
    %44 = arith.mulf %43, %41 : vector<8x128xf32>
    %45 = arith.mulf %32, %9 : vector<8x128xf32>
    %46 = arith.addf %44, %45 : vector<8x128xf32>
    %c0_25 = arith.constant 0 : index
    %c4 = arith.constant 4 : index
    %47 = vector.load %arg1[%c0_25, %c4] : memref<8x16xf32, #tpu.memory_space<vmem>>, vector<8x4xf32>
    %48 = arith.truncf %47 : vector<8x4xf32> to vector<8x4xbf16>
    %cst_26 = arith.constant dense<0.000000e+00> : vector<8x128xf32>
    %49 = tpu.matmul %48, %0, %cst_26 {dimension_numbers = #tpu.dot_dimension_numbers<[1], [0], [0], [1], [0, 0, 1, 1], [], []>} : vector<8x4xbf16>, vector<4x128xbf16>, vector<8x128xf32> -> vector<8x128xf32>
    %50 = vector.broadcast %4 : vector<1x128xf32> to vector<8x128xf32>
    %51 = arith.addf %49, %50 : vector<8x128xf32>
    %cst_27 = arith.constant 0.000000e+00 : f32
    %52 = vector.broadcast %cst_27 : f32 to vector<8x128xf32>
    %53 = arith.maximumf %51, %52 : vector<8x128xf32>
    %54 = arith.truncf %53 : vector<8x128xf32> to vector<8x128xbf16>
    %cst_28 = arith.constant dense<0.000000e+00> : vector<8x384xf32>
    %55 = tpu.matmul %54, %1, %cst_28 {dimension_numbers = #tpu.dot_dimension_numbers<[1], [0], [0], [1], [0, 0, 1, 1], [], []>} : vector<8x128xbf16>, vector<128x384xbf16>, vector<8x384xf32> -> vector<8x384xf32>
    %56 = arith.truncf %46 : vector<8x128xf32> to vector<8x128xbf16>
    %cst_29 = arith.constant dense<0.000000e+00> : vector<8x384xf32>
    %57 = tpu.matmul %56, %2, %cst_29 {dimension_numbers = #tpu.dot_dimension_numbers<[1], [0], [0], [1], [0, 0, 1, 1], [], []>} : vector<8x128xbf16>, vector<128x384xbf16>, vector<8x384xf32> -> vector<8x384xf32>
    %58 = vector.extract_strided_slice %55 {offsets = [0, 0], sizes = [8, 256], strides = [1, 1]} : vector<8x384xf32> to vector<8x256xf32>
    %59 = vector.extract_strided_slice %57 {offsets = [0, 0], sizes = [8, 256], strides = [1, 1]} : vector<8x384xf32> to vector<8x256xf32>
    %60 = arith.addf %58, %59 : vector<8x256xf32>
    %61 = vector.broadcast %5 : vector<1x256xf32> to vector<8x256xf32>
    %62 = arith.addf %60, %61 : vector<8x256xf32>
    %63 = arith.negf %62 : vector<8x256xf32>
    %64 = math.exp %63 : vector<8x256xf32>
    %cst_30 = arith.constant 1.000000e+00 : f32
    %65 = vector.broadcast %cst_30 : f32 to vector<8x256xf32>
    %66 = arith.addf %65, %64 : vector<8x256xf32>
    %67 = arith.divf %65, %66 : vector<8x256xf32>
    %68 = vector.extract_strided_slice %67 {offsets = [0, 0], sizes = [8, 128], strides = [1, 1]} : vector<8x256xf32> to vector<8x128xf32>
    %69 = vector.extract_strided_slice %67 {offsets = [0, 128], sizes = [8, 128], strides = [1, 1]} : vector<8x256xf32> to vector<8x128xf32>
    %70 = vector.extract_strided_slice %55 {offsets = [0, 256], sizes = [8, 128], strides = [1, 1]} : vector<8x384xf32> to vector<8x128xf32>
    %71 = vector.broadcast %6 : vector<1x128xf32> to vector<8x128xf32>
    %72 = arith.addf %70, %71 : vector<8x128xf32>
    %73 = vector.extract_strided_slice %57 {offsets = [0, 256], sizes = [8, 128], strides = [1, 1]} : vector<8x384xf32> to vector<8x128xf32>
    %74 = vector.broadcast %7 : vector<1x128xf32> to vector<8x128xf32>
    %75 = arith.addf %73, %74 : vector<8x128xf32>
    %76 = arith.mulf %68, %75 : vector<8x128xf32>
    %77 = arith.addf %72, %76 : vector<8x128xf32>
    %78 = math.tanh %77 : vector<8x128xf32>
    %cst_31 = arith.constant 1.000000e+00 : f32
    %79 = vector.broadcast %cst_31 : f32 to vector<8x128xf32>
    %80 = arith.subf %79, %69 : vector<8x128xf32>
    %81 = arith.mulf %80, %78 : vector<8x128xf32>
    %82 = arith.mulf %69, %46 : vector<8x128xf32>
    %83 = arith.addf %81, %82 : vector<8x128xf32>
    %c0_32 = arith.constant 0 : index
    %c8 = arith.constant 8 : index
    %84 = vector.load %arg1[%c0_32, %c8] : memref<8x16xf32, #tpu.memory_space<vmem>>, vector<8x4xf32>
    %85 = arith.truncf %84 : vector<8x4xf32> to vector<8x4xbf16>
    %cst_33 = arith.constant dense<0.000000e+00> : vector<8x128xf32>
    %86 = tpu.matmul %85, %0, %cst_33 {dimension_numbers = #tpu.dot_dimension_numbers<[1], [0], [0], [1], [0, 0, 1, 1], [], []>} : vector<8x4xbf16>, vector<4x128xbf16>, vector<8x128xf32> -> vector<8x128xf32>
    %87 = vector.broadcast %4 : vector<1x128xf32> to vector<8x128xf32>
    %88 = arith.addf %86, %87 : vector<8x128xf32>
    %cst_34 = arith.constant 0.000000e+00 : f32
    %89 = vector.broadcast %cst_34 : f32 to vector<8x128xf32>
    %90 = arith.maximumf %88, %89 : vector<8x128xf32>
    %91 = arith.truncf %90 : vector<8x128xf32> to vector<8x128xbf16>
    %cst_35 = arith.constant dense<0.000000e+00> : vector<8x384xf32>
    %92 = tpu.matmul %91, %1, %cst_35 {dimension_numbers = #tpu.dot_dimension_numbers<[1], [0], [0], [1], [0, 0, 1, 1], [], []>} : vector<8x128xbf16>, vector<128x384xbf16>, vector<8x384xf32> -> vector<8x384xf32>
    %93 = arith.truncf %83 : vector<8x128xf32> to vector<8x128xbf16>
    %cst_36 = arith.constant dense<0.000000e+00> : vector<8x384xf32>
    %94 = tpu.matmul %93, %2, %cst_36 {dimension_numbers = #tpu.dot_dimension_numbers<[1], [0], [0], [1], [0, 0, 1, 1], [], []>} : vector<8x128xbf16>, vector<128x384xbf16>, vector<8x384xf32> -> vector<8x384xf32>
    %95 = vector.extract_strided_slice %92 {offsets = [0, 0], sizes = [8, 256], strides = [1, 1]} : vector<8x384xf32> to vector<8x256xf32>
    %96 = vector.extract_strided_slice %94 {offsets = [0, 0], sizes = [8, 256], strides = [1, 1]} : vector<8x384xf32> to vector<8x256xf32>
    %97 = arith.addf %95, %96 : vector<8x256xf32>
    %98 = vector.broadcast %5 : vector<1x256xf32> to vector<8x256xf32>
    %99 = arith.addf %97, %98 : vector<8x256xf32>
    %100 = arith.negf %99 : vector<8x256xf32>
    %101 = math.exp %100 : vector<8x256xf32>
    %cst_37 = arith.constant 1.000000e+00 : f32
    %102 = vector.broadcast %cst_37 : f32 to vector<8x256xf32>
    %103 = arith.addf %102, %101 : vector<8x256xf32>
    %104 = arith.divf %102, %103 : vector<8x256xf32>
    %105 = vector.extract_strided_slice %104 {offsets = [0, 0], sizes = [8, 128], strides = [1, 1]} : vector<8x256xf32> to vector<8x128xf32>
    %106 = vector.extract_strided_slice %104 {offsets = [0, 128], sizes = [8, 128], strides = [1, 1]} : vector<8x256xf32> to vector<8x128xf32>
    %107 = vector.extract_strided_slice %92 {offsets = [0, 256], sizes = [8, 128], strides = [1, 1]} : vector<8x384xf32> to vector<8x128xf32>
    %108 = vector.broadcast %6 : vector<1x128xf32> to vector<8x128xf32>
    %109 = arith.addf %107, %108 : vector<8x128xf32>
    %110 = vector.extract_strided_slice %94 {offsets = [0, 256], sizes = [8, 128], strides = [1, 1]} : vector<8x384xf32> to vector<8x128xf32>
    %111 = vector.broadcast %7 : vector<1x128xf32> to vector<8x128xf32>
    %112 = arith.addf %110, %111 : vector<8x128xf32>
    %113 = arith.mulf %105, %112 : vector<8x128xf32>
    %114 = arith.addf %109, %113 : vector<8x128xf32>
    %115 = math.tanh %114 : vector<8x128xf32>
    %cst_38 = arith.constant 1.000000e+00 : f32
    %116 = vector.broadcast %cst_38 : f32 to vector<8x128xf32>
    %117 = arith.subf %116, %106 : vector<8x128xf32>
    %118 = arith.mulf %117, %115 : vector<8x128xf32>
    %119 = arith.mulf %106, %83 : vector<8x128xf32>
    %120 = arith.addf %118, %119 : vector<8x128xf32>
    %c0_39 = arith.constant 0 : index
    %c12 = arith.constant 12 : index
    %121 = vector.load %arg1[%c0_39, %c12] : memref<8x16xf32, #tpu.memory_space<vmem>>, vector<8x4xf32>
    %122 = arith.truncf %121 : vector<8x4xf32> to vector<8x4xbf16>
    %cst_40 = arith.constant dense<0.000000e+00> : vector<8x128xf32>
    %123 = tpu.matmul %122, %0, %cst_40 {dimension_numbers = #tpu.dot_dimension_numbers<[1], [0], [0], [1], [0, 0, 1, 1], [], []>} : vector<8x4xbf16>, vector<4x128xbf16>, vector<8x128xf32> -> vector<8x128xf32>
    %124 = vector.broadcast %4 : vector<1x128xf32> to vector<8x128xf32>
    %125 = arith.addf %123, %124 : vector<8x128xf32>
    %cst_41 = arith.constant 0.000000e+00 : f32
    %126 = vector.broadcast %cst_41 : f32 to vector<8x128xf32>
    %127 = arith.maximumf %125, %126 : vector<8x128xf32>
    %128 = arith.truncf %127 : vector<8x128xf32> to vector<8x128xbf16>
    %cst_42 = arith.constant dense<0.000000e+00> : vector<8x384xf32>
    %129 = tpu.matmul %128, %1, %cst_42 {dimension_numbers = #tpu.dot_dimension_numbers<[1], [0], [0], [1], [0, 0, 1, 1], [], []>} : vector<8x128xbf16>, vector<128x384xbf16>, vector<8x384xf32> -> vector<8x384xf32>
    %130 = arith.truncf %120 : vector<8x128xf32> to vector<8x128xbf16>
    %cst_43 = arith.constant dense<0.000000e+00> : vector<8x384xf32>
    %131 = tpu.matmul %130, %2, %cst_43 {dimension_numbers = #tpu.dot_dimension_numbers<[1], [0], [0], [1], [0, 0, 1, 1], [], []>} : vector<8x128xbf16>, vector<128x384xbf16>, vector<8x384xf32> -> vector<8x384xf32>
    %132 = vector.extract_strided_slice %129 {offsets = [0, 0], sizes = [8, 256], strides = [1, 1]} : vector<8x384xf32> to vector<8x256xf32>
    %133 = vector.extract_strided_slice %131 {offsets = [0, 0], sizes = [8, 256], strides = [1, 1]} : vector<8x384xf32> to vector<8x256xf32>
    %134 = arith.addf %132, %133 : vector<8x256xf32>
    %135 = vector.broadcast %5 : vector<1x256xf32> to vector<8x256xf32>
    %136 = arith.addf %134, %135 : vector<8x256xf32>
    %137 = arith.negf %136 : vector<8x256xf32>
    %138 = math.exp %137 : vector<8x256xf32>
    %cst_44 = arith.constant 1.000000e+00 : f32
    %139 = vector.broadcast %cst_44 : f32 to vector<8x256xf32>
    %140 = arith.addf %139, %138 : vector<8x256xf32>
    %141 = arith.divf %139, %140 : vector<8x256xf32>
    %142 = vector.extract_strided_slice %141 {offsets = [0, 0], sizes = [8, 128], strides = [1, 1]} : vector<8x256xf32> to vector<8x128xf32>
    %143 = vector.extract_strided_slice %141 {offsets = [0, 128], sizes = [8, 128], strides = [1, 1]} : vector<8x256xf32> to vector<8x128xf32>
    %144 = vector.extract_strided_slice %129 {offsets = [0, 256], sizes = [8, 128], strides = [1, 1]} : vector<8x384xf32> to vector<8x128xf32>
    %145 = vector.broadcast %6 : vector<1x128xf32> to vector<8x128xf32>
    %146 = arith.addf %144, %145 : vector<8x128xf32>
    %147 = vector.extract_strided_slice %131 {offsets = [0, 256], sizes = [8, 128], strides = [1, 1]} : vector<8x384xf32> to vector<8x128xf32>
    %148 = vector.broadcast %7 : vector<1x128xf32> to vector<8x128xf32>
    %149 = arith.addf %147, %148 : vector<8x128xf32>
    %150 = arith.mulf %142, %149 : vector<8x128xf32>
    %151 = arith.addf %146, %150 : vector<8x128xf32>
    %152 = math.tanh %151 : vector<8x128xf32>
    %cst_45 = arith.constant 1.000000e+00 : f32
    %153 = vector.broadcast %cst_45 : f32 to vector<8x128xf32>
    %154 = arith.subf %153, %143 : vector<8x128xf32>
    %155 = arith.mulf %154, %152 : vector<8x128xf32>
    %156 = arith.mulf %143, %120 : vector<8x128xf32>
    %157 = arith.addf %155, %156 : vector<8x128xf32>
    %158 = arith.truncf %157 : vector<8x128xf32> to vector<8x128xbf16>
    %cst_46 = arith.constant dense<0.000000e+00> : vector<8x384xf32>
    %159 = tpu.matmul %158, %2, %cst_46 {dimension_numbers = #tpu.dot_dimension_numbers<[1], [0], [0], [1], [0, 0, 1, 1], [], []>} : vector<8x128xbf16>, vector<128x384xbf16>, vector<8x384xf32> -> vector<8x384xf32>
    %c0_47 = arith.constant 0 : index
    %c0_48 = arith.constant 0 : index
    %160 = vector.load %arg2[%c0_47, %c0_48] : memref<8x384xf32, #tpu.memory_space<vmem>>, vector<8x384xf32>
    %c0_49 = arith.constant 0 : index
    %c0_50 = arith.constant 0 : index
    %161 = vector.load %arg10[%c0_49, %c0_50] : memref<4x384xf32, #tpu.memory_space<vmem>>, vector<4x384xf32>
    %162 = vector.extract_strided_slice %160 {offsets = [0, 0], sizes = [8, 256], strides = [1, 1]} : vector<8x384xf32> to vector<8x256xf32>
    %163 = vector.extract_strided_slice %159 {offsets = [0, 0], sizes = [8, 256], strides = [1, 1]} : vector<8x384xf32> to vector<8x256xf32>
    %164 = arith.addf %162, %163 : vector<8x256xf32>
    %165 = vector.broadcast %5 : vector<1x256xf32> to vector<8x256xf32>
    %166 = arith.addf %164, %165 : vector<8x256xf32>
    %167 = vector.extract_strided_slice %160 {offsets = [0, 256], sizes = [8, 128], strides = [1, 1]} : vector<8x384xf32> to vector<8x128xf32>
    %168 = vector.broadcast %6 : vector<1x128xf32> to vector<8x128xf32>
    %169 = arith.addf %167, %168 : vector<8x128xf32>
    %170 = vector.extract_strided_slice %159 {offsets = [0, 256], sizes = [8, 128], strides = [1, 1]} : vector<8x384xf32> to vector<8x128xf32>
    %171 = vector.broadcast %7 : vector<1x128xf32> to vector<8x128xf32>
    %172 = arith.addf %170, %171 : vector<8x128xf32>
    %173 = vector.extract_strided_slice %161 {offsets = [0, 0], sizes = [1, 256], strides = [1, 1]} : vector<4x384xf32> to vector<1x256xf32>
    %174 = vector.broadcast %173 : vector<1x256xf32> to vector<8x256xf32>
    %175 = arith.addf %166, %174 : vector<8x256xf32>
    %176 = arith.negf %175 : vector<8x256xf32>
    %177 = math.exp %176 : vector<8x256xf32>
    %cst_51 = arith.constant 1.000000e+00 : f32
    %178 = vector.broadcast %cst_51 : f32 to vector<8x256xf32>
    %179 = arith.addf %178, %177 : vector<8x256xf32>
    %180 = arith.divf %178, %179 : vector<8x256xf32>
    %181 = vector.extract_strided_slice %180 {offsets = [0, 0], sizes = [8, 128], strides = [1, 1]} : vector<8x256xf32> to vector<8x128xf32>
    %182 = vector.extract_strided_slice %180 {offsets = [0, 128], sizes = [8, 128], strides = [1, 1]} : vector<8x256xf32> to vector<8x128xf32>
    %183 = vector.extract_strided_slice %161 {offsets = [0, 256], sizes = [1, 128], strides = [1, 1]} : vector<4x384xf32> to vector<1x128xf32>
    %184 = vector.broadcast %183 : vector<1x128xf32> to vector<8x128xf32>
    %185 = arith.addf %169, %184 : vector<8x128xf32>
    %186 = arith.mulf %181, %172 : vector<8x128xf32>
    %187 = arith.addf %185, %186 : vector<8x128xf32>
    %188 = math.tanh %187 : vector<8x128xf32>
    %cst_52 = arith.constant 1.000000e+00 : f32
    %189 = vector.broadcast %cst_52 : f32 to vector<8x128xf32>
    %190 = arith.subf %189, %182 : vector<8x128xf32>
    %191 = arith.mulf %190, %188 : vector<8x128xf32>
    %192 = arith.mulf %182, %157 : vector<8x128xf32>
    %193 = arith.addf %191, %192 : vector<8x128xf32>
    %194 = arith.truncf %193 : vector<8x128xf32> to vector<8x128xbf16>
    %cst_53 = arith.constant dense<0.000000e+00> : vector<8x4xf32>
    %195 = tpu.matmul %194, %3, %cst_53 {dimension_numbers = #tpu.dot_dimension_numbers<[1], [0], [0], [1], [0, 0, 1, 1], [], []>} : vector<8x128xbf16>, vector<128x4xbf16>, vector<8x4xf32> -> vector<8x4xf32>
    %196 = vector.broadcast %8 : vector<1x4xf32> to vector<8x4xf32>
    %197 = arith.addf %195, %196 : vector<8x4xf32>
    %198 = vector.extract_strided_slice %161 {offsets = [1, 0], sizes = [1, 256], strides = [1, 1]} : vector<4x384xf32> to vector<1x256xf32>
    %199 = vector.broadcast %198 : vector<1x256xf32> to vector<8x256xf32>
    %200 = arith.addf %166, %199 : vector<8x256xf32>
    %201 = arith.negf %200 : vector<8x256xf32>
    %202 = math.exp %201 : vector<8x256xf32>
    %cst_54 = arith.constant 1.000000e+00 : f32
    %203 = vector.broadcast %cst_54 : f32 to vector<8x256xf32>
    %204 = arith.addf %203, %202 : vector<8x256xf32>
    %205 = arith.divf %203, %204 : vector<8x256xf32>
    %206 = vector.extract_strided_slice %205 {offsets = [0, 0], sizes = [8, 128], strides = [1, 1]} : vector<8x256xf32> to vector<8x128xf32>
    %207 = vector.extract_strided_slice %205 {offsets = [0, 128], sizes = [8, 128], strides = [1, 1]} : vector<8x256xf32> to vector<8x128xf32>
    %208 = vector.extract_strided_slice %161 {offsets = [1, 256], sizes = [1, 128], strides = [1, 1]} : vector<4x384xf32> to vector<1x128xf32>
    %209 = vector.broadcast %208 : vector<1x128xf32> to vector<8x128xf32>
    %210 = arith.addf %169, %209 : vector<8x128xf32>
    %211 = arith.mulf %206, %172 : vector<8x128xf32>
    %212 = arith.addf %210, %211 : vector<8x128xf32>
    %213 = math.tanh %212 : vector<8x128xf32>
    %cst_55 = arith.constant 1.000000e+00 : f32
    %214 = vector.broadcast %cst_55 : f32 to vector<8x128xf32>
    %215 = arith.subf %214, %207 : vector<8x128xf32>
    %216 = arith.mulf %215, %213 : vector<8x128xf32>
    %217 = arith.mulf %207, %157 : vector<8x128xf32>
    %218 = arith.addf %216, %217 : vector<8x128xf32>
    %219 = arith.truncf %218 : vector<8x128xf32> to vector<8x128xbf16>
    %cst_56 = arith.constant dense<0.000000e+00> : vector<8x4xf32>
    %220 = tpu.matmul %219, %3, %cst_56 {dimension_numbers = #tpu.dot_dimension_numbers<[1], [0], [0], [1], [0, 0, 1, 1], [], []>} : vector<8x128xbf16>, vector<128x4xbf16>, vector<8x4xf32> -> vector<8x4xf32>
    %221 = vector.broadcast %8 : vector<1x4xf32> to vector<8x4xf32>
    %222 = arith.addf %220, %221 : vector<8x4xf32>
    %223 = vector.extract_strided_slice %161 {offsets = [2, 0], sizes = [1, 256], strides = [1, 1]} : vector<4x384xf32> to vector<1x256xf32>
    %224 = vector.broadcast %223 : vector<1x256xf32> to vector<8x256xf32>
    %225 = arith.addf %166, %224 : vector<8x256xf32>
    %226 = arith.negf %225 : vector<8x256xf32>
    %227 = math.exp %226 : vector<8x256xf32>
    %cst_57 = arith.constant 1.000000e+00 : f32
    %228 = vector.broadcast %cst_57 : f32 to vector<8x256xf32>
    %229 = arith.addf %228, %227 : vector<8x256xf32>
    %230 = arith.divf %228, %229 : vector<8x256xf32>
    %231 = vector.extract_strided_slice %230 {offsets = [0, 0], sizes = [8, 128], strides = [1, 1]} : vector<8x256xf32> to vector<8x128xf32>
    %232 = vector.extract_strided_slice %230 {offsets = [0, 128], sizes = [8, 128], strides = [1, 1]} : vector<8x256xf32> to vector<8x128xf32>
    %233 = vector.extract_strided_slice %161 {offsets = [2, 256], sizes = [1, 128], strides = [1, 1]} : vector<4x384xf32> to vector<1x128xf32>
    %234 = vector.broadcast %233 : vector<1x128xf32> to vector<8x128xf32>
    %235 = arith.addf %169, %234 : vector<8x128xf32>
    %236 = arith.mulf %231, %172 : vector<8x128xf32>
    %237 = arith.addf %235, %236 : vector<8x128xf32>
    %238 = math.tanh %237 : vector<8x128xf32>
    %cst_58 = arith.constant 1.000000e+00 : f32
    %239 = vector.broadcast %cst_58 : f32 to vector<8x128xf32>
    %240 = arith.subf %239, %232 : vector<8x128xf32>
    %241 = arith.mulf %240, %238 : vector<8x128xf32>
    %242 = arith.mulf %232, %157 : vector<8x128xf32>
    %243 = arith.addf %241, %242 : vector<8x128xf32>
    %244 = arith.truncf %243 : vector<8x128xf32> to vector<8x128xbf16>
    %cst_59 = arith.constant dense<0.000000e+00> : vector<8x4xf32>
    %245 = tpu.matmul %244, %3, %cst_59 {dimension_numbers = #tpu.dot_dimension_numbers<[1], [0], [0], [1], [0, 0, 1, 1], [], []>} : vector<8x128xbf16>, vector<128x4xbf16>, vector<8x4xf32> -> vector<8x4xf32>
    %246 = vector.broadcast %8 : vector<1x4xf32> to vector<8x4xf32>
    %247 = arith.addf %245, %246 : vector<8x4xf32>
    %248 = vector.extract_strided_slice %161 {offsets = [3, 0], sizes = [1, 256], strides = [1, 1]} : vector<4x384xf32> to vector<1x256xf32>
    %249 = vector.broadcast %248 : vector<1x256xf32> to vector<8x256xf32>
    %250 = arith.addf %166, %249 : vector<8x256xf32>
    %251 = arith.negf %250 : vector<8x256xf32>
    %252 = math.exp %251 : vector<8x256xf32>
    %cst_60 = arith.constant 1.000000e+00 : f32
    %253 = vector.broadcast %cst_60 : f32 to vector<8x256xf32>
    %254 = arith.addf %253, %252 : vector<8x256xf32>
    %255 = arith.divf %253, %254 : vector<8x256xf32>
    %256 = vector.extract_strided_slice %255 {offsets = [0, 0], sizes = [8, 128], strides = [1, 1]} : vector<8x256xf32> to vector<8x128xf32>
    %257 = vector.extract_strided_slice %255 {offsets = [0, 128], sizes = [8, 128], strides = [1, 1]} : vector<8x256xf32> to vector<8x128xf32>
    %258 = vector.extract_strided_slice %161 {offsets = [3, 256], sizes = [1, 128], strides = [1, 1]} : vector<4x384xf32> to vector<1x128xf32>
    %259 = vector.broadcast %258 : vector<1x128xf32> to vector<8x128xf32>
    %260 = arith.addf %169, %259 : vector<8x128xf32>
    %261 = arith.mulf %256, %172 : vector<8x128xf32>
    %262 = arith.addf %260, %261 : vector<8x128xf32>
    %263 = math.tanh %262 : vector<8x128xf32>
    %cst_61 = arith.constant 1.000000e+00 : f32
    %264 = vector.broadcast %cst_61 : f32 to vector<8x128xf32>
    %265 = arith.subf %264, %257 : vector<8x128xf32>
    %266 = arith.mulf %265, %263 : vector<8x128xf32>
    %267 = arith.mulf %257, %157 : vector<8x128xf32>
    %268 = arith.addf %266, %267 : vector<8x128xf32>
    %269 = arith.truncf %268 : vector<8x128xf32> to vector<8x128xbf16>
    %cst_62 = arith.constant dense<0.000000e+00> : vector<8x4xf32>
    %270 = tpu.matmul %269, %3, %cst_62 {dimension_numbers = #tpu.dot_dimension_numbers<[1], [0], [0], [1], [0, 0, 1, 1], [], []>} : vector<8x128xbf16>, vector<128x4xbf16>, vector<8x4xf32> -> vector<8x4xf32>
    %271 = vector.broadcast %8 : vector<1x4xf32> to vector<8x4xf32>
    %272 = arith.addf %270, %271 : vector<8x4xf32>
    %cst_63 = arith.constant 0.000000e+00 : f32
    %273 = vector.broadcast %cst_63 : f32 to vector<8x112xf32>
    %274 = tpu.concatenate %197, %222, %247, %272, %273 in 1 : vector<8x4xf32>, vector<8x4xf32>, vector<8x4xf32>, vector<8x4xf32>, vector<8x112xf32> -> vector<8x128xf32>
    %c0_64 = arith.constant 0 : index
    %c0_65 = arith.constant 0 : index
    %275 = vector.load %arg13[%c0_64, %c0_65] : memref<8x128xf32, #tpu.memory_space<vmem>>, vector<8x128xf32>
    tpu.vector_store %arg13[%c0_64, %c0_65], %274 {strides = array<i32>} : memref<8x128xf32, #tpu.memory_space<vmem>>, vector<8x128xf32>,
    return
  }
  func.func @transform_0(%arg0: i32) -> (i32, i32) {
    %c0_i32 = arith.constant 0 : i32
    %c0_i32_0 = arith.constant 0 : i32
    return %arg0, %c0_i32 : i32, i32
  }
  func.func @transform_1(%arg0: i32) -> (i32, i32) {
    %c0_i32 = arith.constant 0 : i32
    %c0_i32_0 = arith.constant 0 : i32
    return %arg0, %c0_i32 : i32, i32
  }
  func.func @transform_2(%arg0: i32) -> (i32, i32) {
    %c0_i32 = arith.constant 0 : i32
    %c0_i32_0 = arith.constant 0 : i32
    %c0_i32_1 = arith.constant 0 : i32
    return %c0_i32, %c0_i32_0 : i32, i32
  }
  func.func @transform_3(%arg0: i32) -> (i32, i32) {
    %c0_i32 = arith.constant 0 : i32
    %c0_i32_0 = arith.constant 0 : i32
    %c0_i32_1 = arith.constant 0 : i32
    return %c0_i32, %c0_i32_0 : i32, i32
  }
  func.func @transform_4(%arg0: i32) -> (i32, i32) {
    %c0_i32 = arith.constant 0 : i32
    %c0_i32_0 = arith.constant 0 : i32
    %c0_i32_1 = arith.constant 0 : i32
    return %c0_i32, %c0_i32_0 : i32, i32
  }
  func.func @transform_5(%arg0: i32) -> (i32, i32) {
    %c0_i32 = arith.constant 0 : i32
    %c0_i32_0 = arith.constant 0 : i32
    %c0_i32_1 = arith.constant 0 : i32
    return %c0_i32, %c0_i32_0 : i32, i32
  }
  func.func @transform_6(%arg0: i32) -> (i32, i32) {
    %c0_i32 = arith.constant 0 : i32
    %c0_i32_0 = arith.constant 0 : i32
    %c0_i32_1 = arith.constant 0 : i32
    return %c0_i32, %c0_i32_0 : i32, i32
  }
  func.func @transform_7(%arg0: i32) -> (i32, i32) {
    %c0_i32 = arith.constant 0 : i32
    %c0_i32_0 = arith.constant 0 : i32
    %c0_i32_1 = arith.constant 0 : i32
    return %c0_i32, %c0_i32_0 : i32, i32
  }
  func.func @transform_8(%arg0: i32) -> (i32, i32) {
    %c0_i32 = arith.constant 0 : i32
    %c0_i32_0 = arith.constant 0 : i32
    %c0_i32_1 = arith.constant 0 : i32
    return %c0_i32, %c0_i32_0 : i32, i32
  }
  func.func @transform_9(%arg0: i32) -> (i32, i32) {
    %c0_i32 = arith.constant 0 : i32
    %c0_i32_0 = arith.constant 0 : i32
    %c0_i32_1 = arith.constant 0 : i32
    return %c0_i32, %c0_i32_0 : i32, i32
  }
  func.func @transform_10(%arg0: i32) -> (i32, i32) {
    %c0_i32 = arith.constant 0 : i32
    %c0_i32_0 = arith.constant 0 : i32
    %c0_i32_1 = arith.constant 0 : i32
    return %c0_i32, %c0_i32_0 : i32, i32
  }
  func.func @transform_11(%arg0: i32) -> (i32, i32) {
    %c0_i32 = arith.constant 0 : i32
    %c0_i32_0 = arith.constant 0 : i32
    %c0_i32_1 = arith.constant 0 : i32
    return %c0_i32, %c0_i32_0 : i32, i32
  }
  func.func @transform_12(%arg0: i32) -> (i32, i32) {
    %c0_i32 = arith.constant 0 : i32
    %c0_i32_0 = arith.constant 0 : i32
    return %arg0, %c0_i32 : i32, i32
  }
}

</mosaic_0001>

<bundles_post_ra>
// kernel: tile.9
= control target key start
LH: loop header
LB: loop body
LE: loop exit
PB: predicated region body
PF: predicated region fallthrough
CT: control target
= control target key end

     0   :  { %s112_s0 = inlined_call_operand.vmem [shape: f32[2,4,384], index: 0, kind: input, shape index: {}]   ;;  %s113_s1 = inlined_call_operand.vmem [shape: f32[8,384], index: 1, kind: output, shape index: {}]  }
   0x1   :  { %v56_v0 = vld [vmem:[%s112_s0 + $0x14] sm:$0xf]  ;;  %v57_v1 = vld [vmem:[%s112_s0 + $0x10] sm:$0xf]  ;;  %v58_v2 = vld [vmem:[%s112_s0 + $0xc] sm:$0xf] }
   0x2   :  { %8 = vst [vmem:[#allocation0 + $0x28] sm:$0xf] %v56_v0  ;;  %13 = vst [vmem:[#allocation0 + $0x20] sm:$0xf] %v57_v1  ;;  %v59_v3 = vld [vmem:[%s112_s0 + $0x8] sm:$0xf] }
   0x3   :  { %18 = vst [vmem:[#allocation0 + $0x18] sm:$0xf] %v58_v2  ;;  %v60_v4 = vld [vmem:[%s112_s0 + $0x4] sm:$0xf]  ;;  %v28_v5 = vld [vmem:[%s112_s0] sm:$0xf] }
   0x4   :  { %23 = vst [vmem:[#allocation0 + $0x10] sm:$0xf] %v59_v3  ;;  %27 = vst [vmem:[#allocation0 + $0x8] sm:$0xf] %v60_v4 }
   0x5   :  { %29 = vst [vmem:[#allocation0] sm:$0xf] %v28_v5 }
   0x9   :  { %v45_v7 = vld [vmem:[#allocation0 + $0x20] sm:$0xf]   ;;  %v49_v8 = vld [vmem:[#allocation0 + $0x28] sm:$0xf]  }
   0xa   :  { %v41_v6 = vld [vmem:[#allocation0 + $0x18] sm:$0xf]   ;;  %64 = vst [vmem:[%s113_s1 + $0xc] sm:$0xf] %v45_v7   ;;  %65 = vst [vmem:[%s113_s1 + $0x14] sm:$0xf] %v49_v8  }
   0xb   :  { %v33_v10 = vld [vmem:[#allocation0 + $0x8] sm:$0xf]   ;;  %v37_v11 = vld [vmem:[#allocation0 + $0x10] sm:$0xf]   ;;  %63 = vst [vmem:[%s113_s1 + $0x4] sm:$0xf] %v41_v6  }
   0xc   :  { %v30_v9 = vld [vmem:[#allocation0] sm:$0xf]   ;;  %61 = vst [vmem:[%s113_s1 + $0x8] sm:$0xf] %v33_v10   ;;  %62 = vst [vmem:[%s113_s1 + $0x10] sm:$0xf] %v37_v11  }
   0xd   :  { %31 = vst [vmem:[%s113_s1] sm:$0xf] %v30_v9  }

// kernel: segrnn_forward.1
= control target key start
LH: loop header
LB: loop body
LE: loop exit
PB: predicated region body
PF: predicated region fallthrough
CT: control target
= control target key end

     0   :  { %vm140_vm0 = vcmask 1041408   ;;  %v3448_v0 = vmov 0.0   ;;  %vm2522_vm1 = vmmov 0   ;;  %vm136_vm2 = vcmask 31744   ;;  %s2525_s16 = smov 120   ;;  %s2527_s24 = smov 4   ;;  %s3433_s2 = inlined_call_operand.vmem [shape: bf16[4,128], index: 2, kind: input, shape index: {}]   ;;  %s3434_s0 = inlined_call_operand.vmem [shape: f32[8,16], index: 0, kind: input, shape index: {}]   ;;  %s3435_s4 = inlined_call_operand.vmem [shape: bf16[128,384], index: 4, kind: input, shape index: {}]   ;;  %s3436_s5 = inlined_call_operand.vmem [shape: bf16[128,384], index: 5, kind: input, shape index: {}]   ;;  %s3437_s3 = inlined_call_operand.vmem [shape: f32[1,128], index: 3, kind: input, shape index: {}]   ;;  %s3438_s6 = inlined_call_operand.vmem [shape: f32[1,256], index: 6, kind: input, shape index: {}]   ;;  %s3439_s8 = inlined_call_operand.vmem [shape: f32[1,128], index: 8, kind: input, shape index: {}]   ;;  %s3440_s7 = inlined_call_operand.vmem [shape: f32[1,128], index: 7, kind: input, shape index: {}]   ;;  %s3441_s10 = inlined_call_operand.vmem [shape: bf16[128,4], index: 10, kind: input, shape index: {}]   ;;  %s3442_s9 = inlined_call_operand.vmem [shape: f32[4,384], index: 9, kind: input, shape index: {}]   ;;  %s3443_s1 = inlined_call_operand.vmem [shape: f32[8,384], index: 1, kind: input, shape index: {}]   ;;  %s3444_s11 = inlined_call_operand.vmem [shape: f32[1,4], index: 11, kind: input, shape index: {}]   ;;  %s3445_s12 = inlined_call_operand.vmem [shape: f32[8,128], index: 12, kind: output, shape index: {}]  }
   0x1   :  { %2075 = vmatprep.subr.bf16.mxu0 %v3448_v0  ;;  %v42_v1 = vld [vmem:[%s3433_s2] sm:$0x3]  ;;  %2077 = vmatprep.mubr.msk.bf16.mxu0 %vm2522_vm1, %v3448_v0  ;;  %v2611_v5 = vld [vmem:[%s3435_s4 + $0x4] ss:$12 sps:$4 sm:$0xff]   ;;  %v2622_v7 = vld [vmem:[%s3435_s4 + $0x8] ss:$12 sps:$4 sm:$0xff]  }
   0x2   :  { %v128_v2 = vld [vmem:[%s3434_s0] sm:$0xff]  ;;  %v2604_v3 = vsel %vm140_vm0, %v42_v1, 0  ;;  %s2523_s0 = smov 124   ;;  %314 = vmatprep.subr.bf16.mxu1 %v2611_v5  ;;  %v2629_v8 = vld [vmem:[%s3435_s4 + $0x1c] ss:$12 sps:$4 sm:$0xff]   ;;  %v3446_v30 = vmov 0  }
   0x3   :  { %v2606_v4 = vpack.c.bf16 %v128_v2, %v128_v2  ;;  %v2616_v6 = vld [vmem:[%s3435_s4] ss:$12 sps:$4 sm:$0xff]   ;;  %2076 = vmatpush3.bf16.msra.mxu0 %v2604_v3  ;;  %v2636_v9 = vld [vmem:[%s3435_s4 + $0x18] ss:$12 sps:$4 sm:$0xff]   ;;  %v2659_v12 = vld [vmem:[%s3435_s4 + $0x30] ss:$12 sps:$4 sm:$0xff]   ;;  %346 = vmatprep.mubr.bf16.mxu1 %v3446_v30 }
   0x4   :  { %315 = vmatpush1.bf16.msra.mxu1 %v2616_v6  ;;  %2081 = vmatprep.subr.bf16.mxu0 %v3448_v0  ;;  %v2645_v10 = vld [vmem:[%s3435_s4 + $0x20] ss:$12 sps:$4 sm:$0xff]   ;;  %v2671_v14 = vld [vmem:[%s3435_s4 + $0x38] ss:$12 sps:$4 sm:$0xff]   ;;  %v2678_v15 = vld [vmem:[%s3435_s4 + $0x48] ss:$12 sps:$4 sm:$0xff]  }
   0x5   :  { %653 = vrot.lane.b32.xlu0 %v2606_v4, %s2523_s0  ;;  %316 = vmatprep.subr.bf16.mxu1 %v2629_v8  ;;  %v2650_v11 = vld [vmem:[%s3435_s4 + $0x34] ss:$12 sps:$4 sm:$0xff]   ;;  %v2665_v13 = vld [vmem:[%s3435_s4 + $0x4c] ss:$12 sps:$4 sm:$0xff]   ;;  %3478 = vst [vmem:[#allocation2_spill] sm:$0xff] %v2671_v14  ;;  %s2529_s25 = smov 12  }
   0x6   :  { %2078 = vmatmul.mubr.msk.bf16.vlgmr.msra.gmra.mrb[0].mxu0 %vm136_vm2, %v2606_v4  ;;  %v2684_v16 = vld [vmem:[%s3435_s4 + $0x64] ss:$12 sps:$4 sm:$0xff]   ;;  %v2696_v18 = vld [vmem:[%s3435_s4 + $0x60] ss:$12 sps:$4 sm:$0xff]   ;;  %v2702_v19 = vld [vmem:[%s3435_s4 + $0x7c] ss:$12 sps:$4 sm:$0xff]  }
   0x7   :  { %2082 = vmatpush3.bf16.msra.mxu0 %v2622_v7  ;;  %2097 = vmatprep.mubr.msk.bf16.mxu0 %vm2522_vm1, %v3448_v0  ;;  %v2690_v17 = vld [vmem:[%s3435_s4 + $0x50] ss:$12 sps:$4 sm:$0xff]   ;;  %3480 = vst [vmem:[#allocation4_spill] sm:$0xff] %v2696_v18  ;;  %3481 = vst [vmem:[#allocation5_spill] sm:$0xff] %v2702_v19  ;;  %v2709_v20 = vld [vmem:[%s3435_s4 + $0x68] ss:$12 sps:$4 sm:$0xff]  }
   0x8   :  { %2083 = vmatprep.subr.bf16.mxu0 %v3448_v0  ;;  %317 = vmatpush1.bf16.msra.mxu1 %v2636_v9  ;;  %3479 = vst [vmem:[#allocation3_spill] sm:$0xff] %v2690_v17  ;;  %3482 = vst [vmem:[#allocation6_spill] sm:$0xff] %v2709_v20  ;;  %v2716_v21 = vld [vmem:[%s3435_s4 + $0x78] ss:$12 sps:$4 sm:$0xff]   ;;  %v2722_v22 = vld [vmem:[%s3435_s4 + $0x94] ss:$12 sps:$4 sm:$0xff]  }
   0x9   :  { %318 = vmatprep.subr.bf16.mxu1 %v2650_v11  ;;  %3483 = vst [vmem:[#allocation7_spill] sm:$0xff] %v2716_v21  ;;  %3484 = vst [vmem:[#allocation8_spill] sm:$0xff] %v2722_v22  ;;  %v2728_v23 = vld [vmem:[%s3435_s4 + $0x80] ss:$12 sps:$4 sm:$0xff]   ;;  %v2735_v24 = vld [vmem:[%s3435_s4 + $0x90] ss:$12 sps:$4 sm:$0xff]   ;;  %888 = vrot.lane.b32.xlu0 %v2606_v4, %s2525_s16 }
   0xa   :  { %3485 = vst [vmem:[#allocation9_spill] sm:$0xff] %v2728_v23  ;;  %3486 = vst [vmem:[#allocation10_spill] sm:$0xff] %v2735_v24  ;;  %v2744_v25 = vld [vmem:[%s3435_s4 + $0x98] ss:$12 sps:$4 sm:$0xff]   ;;  %v2755_v27 = vld [vmem:[%s3435_s4 + $0xa8] ss:$12 sps:$4 sm:$0xff]  }
   0xb   :  { %2084 = vmatpush3.bf16.msra.mxu0 %v2645_v10  ;;  %3487 = vst [vmem:[#allocation11_spill] sm:$0xff] %v2744_v25  ;;  %v2750_v26 = vld [vmem:[%s3435_s4 + $0xac] ss:$12 sps:$4 sm:$0xff]   ;;  %3489 = vst [vmem:[#allocation13_spill] sm:$0xff] %v2755_v27  ;;  %v2762_v28 = vld [vmem:[%s3435_s4 + $0xb0] ss:$12 sps:$4 sm:$0xff]  }
   0xc   :  { %2085 = vmatprep.subr.bf16.mxu0 %v3448_v0  ;;  %319 = vmatpush1.bf16.msra.mxu1 %v2659_v12  ;;  %3488 = vst [vmem:[#allocation12_spill] sm:$0xff] %v2750_v26  ;;  %3490 = vst [vmem:[#allocation14_spill] sm:$0xff] %v2762_v28  ;;  %v2769_v29 = vld [vmem:[%s3436_s5 + $0x4] ss:$12 sps:$4 sm:$0xff]   ;;  %v2778_v31 = vld [vmem:[%s3437_s3] ss:$0 sm:$0xff] }
   0xd   :  { %320 = vmatprep.subr.bf16.mxu1 %v2665_v13  ;;  %3491 = vst [vmem:[#allocation15_spill] sm:$0xff] %v2769_v29  ;;  %v2784_v38 = vld [vmem:[%s3436_s5] ss:$12 sps:$4 sm:$0xff]   ;;  %v2789_v39 = vld [vmem:[%s3436_s5 + $0x8] ss:$12 sps:$4 sm:$0xff]   ;;  %vm1859_vm3 = vcmask 64512  }
   0xe   :  { %v2794_v41 = vld [vmem:[%s3436_s5 + $0x1c] ss:$12 sps:$4 sm:$0xff]   ;;  %v2800_v42 = vld [vmem:[%s3436_s5 + $0x18] ss:$12 sps:$4 sm:$0xff]   ;;  %v2806_v43 = vld [vmem:[%s3436_s5 + $0x20] ss:$12 sps:$4 sm:$0xff]  }
   0xf   :  { %2086 = vmatpush3.bf16.msra.mxu0 %v2671_v14  ;;  %v2812_v44 = vld [vmem:[%s3436_s5 + $0x34] ss:$12 sps:$4 sm:$0xff]   ;;  %v2822_v45 = vld [vmem:[%s3436_s5 + $0x30] ss:$12 sps:$4 sm:$0xff]   ;;  %v2828_v46 = vld [vmem:[%s3436_s5 + $0x38] ss:$12 sps:$4 sm:$0xff]  }
  0x10   :  { %2087 = vmatprep.subr.bf16.mxu0 %v3448_v0  ;;  %321 = vmatpush1.bf16.msra.mxu1 %v2678_v15  ;;  %v2834_v47 = vld [vmem:[%s3436_s5 + $0x4c] ss:$12 sps:$4 sm:$0xff]   ;;  %v2841_v48 = vld [vmem:[%s3436_s5 + $0x48] ss:$12 sps:$4 sm:$0xff]   ;;  %v2847_v49 = vld [vmem:[%s3436_s5 + $0x50] ss:$12 sps:$4 sm:$0xff]  }
  0x11   :  { %322 = vmatprep.subr.bf16.mxu1 %v2684_v16  ;;  %v2853_v50 = vld [vmem:[%s3436_s5 + $0x64] ss:$12 sps:$4 sm:$0xff]   ;;  %v2860_v51 = vld [vmem:[%s3436_s5 + $0x60] ss:$12 sps:$4 sm:$0xff]   ;;  %v2866_v52 = vld [vmem:[%s3436_s5 + $0x68] ss:$12 sps:$4 sm:$0xff]  }
  0x12   :  { %v2872_v53 = vld [vmem:[%s3436_s5 + $0x7c] ss:$12 sps:$4 sm:$0xff]   ;;  %v2879_v54 = vld [vmem:[%s3436_s5 + $0x78] ss:$12 sps:$4 sm:$0xff]   ;;  %v2885_v55 = vld [vmem:[%s3436_s5 + $0x80] ss:$12 sps:$4 sm:$0xff]  }
  0x13   :  { %2088 = vmatpush3.bf16.msra.mxu0 %v2690_v17  ;;  %v2891_v56 = vld [vmem:[%s3436_s5 + $0x94] ss:$12 sps:$4 sm:$0xff]   ;;  %v2898_v57 = vld [vmem:[%s3436_s5 + $0x90] ss:$12 sps:$4 sm:$0xff]   ;;  %v2904_v58 = vld [vmem:[%s3436_s5 + $0x98] ss:$12 sps:$4 sm:$0xff]  }
  0x14   :  { %2089 = vmatprep.subr.bf16.mxu0 %v3448_v0  ;;  %323 = vmatpush1.bf16.msra.mxu1 %v2696_v18  ;;  %v2910_v59 = vld [vmem:[%s3436_s5 + $0xac] ss:$12 sps:$4 sm:$0xff]   ;;  %v2917_v60 = vld [vmem:[%s3436_s5 + $0xa8] ss:$12 sps:$4 sm:$0xff]   ;;  %v2923_v61 = vld [vmem:[%s3436_s5 + $0xb0] ss:$12 sps:$4 sm:$0xff]  }
  0x15   :  { %324 = vmatprep.subr.bf16.mxu1 %v2702_v19  ;;  %s2526_s5 = smov 116   ;;  %vm1861_vm4 = vcmask 97280   ;;  %vm1863_vm5 = vcmask 130048  }
  0x16   :  { %1123 = vrot.lane.b32.xlu1 %v2606_v4, %s2526_s5 }
  0x17   :  { %2090 = vmatpush3.bf16.msra.mxu0 %v2709_v20 }
  0x18   :  { %2091 = vmatprep.subr.bf16.mxu0 %v3448_v0  ;;  %325 = vmatpush1.bf16.msra.mxu1 %v2716_v21 }
  0x19   :  { %326 = vmatprep.subr.bf16.mxu1 %v2722_v22 }
  0x1b   :  { %2092 = vmatpush3.bf16.msra.mxu0 %v2728_v23 }
  0x1c   :  { %2093 = vmatprep.subr.bf16.mxu0 %v3448_v0  ;;  %327 = vmatpush1.bf16.msra.mxu1 %v2735_v24 }
  0x1d   :  { %328 = vmatprep.subr.bf16.mxu1 %v2750_v26 }
  0x1f   :  { %2094 = vmatpush3.bf16.msra.mxu0 %v2744_v25 }
  0x20   :  { %2095 = vmatprep.subr.bf16.mxu0 %v3448_v0  ;;  %329 = vmatpush1.bf16.msra.mxu1 %v2755_v27 }
  0x21   :  { %523 = vmatprep.subr.bf16.mxu1 %v2769_v29 }
  0x23   :  { %2096 = vmatpush3.bf16.msra.mxu0 %v2762_v28 }
  0x24   :  { %2101 = vmatprep.subr.bf16.mxu0 %v3448_v0 }
  0x77   :  { %v654_v62 = vpop.permute.xlu0 %653 }
  0xd9   :  { %v178_v32 = vpop.f32.mrb[0].mxu0 }
  0xda   :  { %v179_v33 = vadd.f32 %v2778_v31, %v178_v32  ;;  %v2079_v34 = vpop.f32.mrb[1].mxu0 }
  0xdb   :  { %v181_v35 = vpop.f32.mrb[2].mxu0 }
  0xdc   :  { %v184_v36 = vmax.f32 %v179_v33, 0.0  ;;  %v2080_v37 = vpop.f32.mrb[3].mxu0 }
  0xdd   :  { %v607_v37 = vlaneseq }
  0xde   :  { %v185_v40 = vpack.c.bf16 %v184_v36, %v184_v36 }
  0xe0   :  { %347 = vmatmul.mubr.bf16.vlgmr.msra.gmra.mrb[0].mxu1 %v185_v40  ;;  %2098 = vmatmul.mubr.bf16.vlgmr.msra.gmra.mrb[4].mxu0 %v185_v40  ;;  %v2976_v40 = vshrl.u32 %v607_v37, 7 }
  0xe1   :  { %524 = vmatpush1.bf16.msra.mxu1 %v2784_v38  ;;  %2102 = vmatpush3.bf16.msra.mxu0 %v2789_v39 }
  0xe2   :  { %525 = vmatprep.subr.bf16.mxu1 %v2794_v41  ;;  %2103 = vmatprep.subr.bf16.mxu0 %v3448_v0  ;;  %3492 = vst [vmem:[#allocation16_spill] sm:$0xff] %v2976_v40  ;;  %v2985_v4 = vsub.s32 1, %v2976_v40 }
  0xe3   :  { %555 = vmatprep.mubr.bf16.mxu1 %v3446_v30  ;;  %2117 = vmatprep.mubr.msk.bf16.mxu0 %vm2522_vm1, %v3448_v0 }
  0xe4   :  { %3494 = vst [vmem:[#allocation18_spill] sm:$0xff] %v2985_v4 }
  0xe5   :  { %526 = vmatpush1.bf16.msra.mxu1 %v2800_v42  ;;  %2104 = vmatpush3.bf16.msra.mxu0 %v2806_v43 }
  0xe6   :  { %527 = vmatprep.subr.bf16.mxu1 %v2812_v44  ;;  %2105 = vmatprep.subr.bf16.mxu0 %v3448_v0 }
  0xe9   :  { %528 = vmatpush1.bf16.msra.mxu1 %v2822_v45  ;;  %2106 = vmatpush3.bf16.msra.mxu0 %v2828_v46 }
  0xea   :  { %529 = vmatprep.subr.bf16.mxu1 %v2834_v47  ;;  %2107 = vmatprep.subr.bf16.mxu0 %v3448_v0 }
  0xed   :  { %530 = vmatpush1.bf16.msra.mxu1 %v2841_v48  ;;  %2108 = vmatpush3.bf16.msra.mxu0 %v2847_v49 }
  0xee   :  { %531 = vmatprep.subr.bf16.mxu1 %v2853_v50  ;;  %2109 = vmatprep.subr.bf16.mxu0 %v3448_v0 }
  0xf1   :  { %532 = vmatpush1.bf16.msra.mxu1 %v2860_v51  ;;  %2110 = vmatpush3.bf16.msra.mxu0 %v2866_v52 }
  0xf2   :  { %533 = vmatprep.subr.bf16.mxu1 %v2872_v53  ;;  %2111 = vmatprep.subr.bf16.mxu0 %v3448_v0 }
  0xf5   :  { %534 = vmatpush1.bf16.msra.mxu1 %v2879_v54  ;;  %2112 = vmatpush3.bf16.msra.mxu0 %v2885_v55 }
  0xf6   :  { %535 = vmatprep.subr.bf16.mxu1 %v2891_v56  ;;  %2113 = vmatprep.subr.bf16.mxu0 %v3448_v0 }
  0xf9   :  { %536 = vmatpush1.bf16.msra.mxu1 %v2898_v57  ;;  %2114 = vmatpush3.bf16.msra.mxu0 %v2904_v58 }
  0xfa   :  { %537 = vmatprep.subr.bf16.mxu1 %v2910_v59  ;;  %2115 = vmatprep.subr.bf16.mxu0 %v3448_v0 }
  0xfd   :  { %538 = vmatpush1.bf16.msra.mxu1 %v2917_v60  ;;  %2116 = vmatpush3.bf16.msra.mxu0 %v2923_v61 }
  0xfe   :  { %2121 = vmatprep.subr.bf16.mxu1 %v3448_v0  ;;  %700 = vmatprep.subr.bf16.mxu0 %v2611_v5 }
 0x100   :  { %556 = vmatmul.mubr.bf16.vlgmr.msra.gmra.mrb[4].mxu1 %v3446_v30  ;;  %2118 = vmatmul.mubr.bf16.vlgmr.msra.gmra.mrb[8].mxu0 %v3446_v30 }
 0x101   :  { %2122 = vmatpush3.bf16.msra.mxu1 %v2604_v3  ;;  %2123 = vmatprep.mubr.msk.bf16.mxu1 %vm2522_vm1, %v3448_v0 }
 0x102   :  { %2127 = vmatprep.subr.bf16.mxu1 %v3448_v0  ;;  %701 = vmatpush1.bf16.msra.mxu0 %v2616_v6 }
 0x103   :  { %702 = vmatprep.subr.bf16.mxu0 %v2629_v8  ;;  %732 = vmatprep.mubr.bf16.mxu0 %v3446_v30  ;;  %v124_v30 = vld [vmem:[%s3438_s6] sm:$0x3] }
 0x106   :  { %703 = vmatpush1.bf16.msra.mxu0 %v2636_v9 }
 0x107   :  { %704 = vmatprep.subr.bf16.mxu0 %v2650_v11 }
 0x108   :  { %2124 = vmatmul.mubr.msk.bf16.vlgmr.msra.gmra.mrb[8].mxu1 %vm136_vm2, %v654_v62  ;;  %v2979_v62 = vsub.s32 0, %v2976_v40 }
 0x109   :  { %2128 = vmatpush3.bf16.msra.mxu1 %v2622_v7  ;;  %2143 = vmatprep.mubr.msk.bf16.mxu1 %vm2522_vm1, %v3448_v0 }
 0x10a   :  { %2129 = vmatprep.subr.bf16.mxu1 %v3448_v0  ;;  %705 = vmatpush1.bf16.msra.mxu0 %v2659_v12  ;;  %3493 = vst [vmem:[#allocation17_spill] sm:$0xff] %v2979_v62 }
 0x10b   :  { %706 = vmatprep.subr.bf16.mxu0 %v2665_v13 }
 0x10d   :  { %2130 = vmatpush3.bf16.msra.mxu1 %v2645_v10 }
 0x10e   :  { %2131 = vmatprep.subr.bf16.mxu1 %v3448_v0  ;;  %707 = vmatpush1.bf16.msra.mxu0 %v2678_v15 }
 0x10f   :  { %708 = vmatprep.subr.bf16.mxu0 %v2684_v16 }
 0x111   :  { %2132 = vmatpush3.bf16.msra.mxu1 %v2671_v14 }
 0x112   :  { %2133 = vmatprep.subr.bf16.mxu1 %v3448_v0  ;;  %709 = vmatpush1.bf16.msra.mxu0 %v2696_v18 }
 0x113   :  { %710 = vmatprep.subr.bf16.mxu0 %v2702_v19 }
 0x115   :  { %2134 = vmatpush3.bf16.msra.mxu1 %v2690_v17 }
 0x116   :  { %2135 = vmatprep.subr.bf16.mxu1 %v3448_v0  ;;  %711 = vmatpush1.bf16.msra.mxu0 %v2716_v21 }
 0x117   :  { %712 = vmatprep.subr.bf16.mxu0 %v2722_v22 }
 0x119   :  { %2136 = vmatpush3.bf16.msra.mxu1 %v2709_v20 }
 0x11a   :  { %2137 = vmatprep.subr.bf16.mxu1 %v3448_v0  ;;  %713 = vmatpush1.bf16.msra.mxu0 %v2735_v24 }
 0x11b   :  { %714 = vmatprep.subr.bf16.mxu0 %v2750_v26 }
 0x11d   :  { %2138 = vmatpush3.bf16.msra.mxu1 %v2728_v23 }
 0x11e   :  { %2139 = vmatprep.subr.bf16.mxu1 %v3448_v0  ;;  %715 = vmatpush1.bf16.msra.mxu0 %v2755_v27 }
 0x11f   :  { %782 = vmatprep.subr.bf16.mxu0 %v2769_v29 }
 0x121   :  { %2140 = vmatpush3.bf16.msra.mxu1 %v2744_v25 }
 0x122   :  { %2141 = vmatprep.subr.bf16.mxu1 %v3448_v0 }
 0x125   :  { %2142 = vmatpush3.bf16.msra.mxu1 %v2762_v28  ;;  %v2991_v28 = vrot.slane %v124_v30, %v2985_v4 }
 0x126   :  { %2147 = vmatprep.subr.bf16.mxu1 %v3448_v0  ;;  %v2988_v0 = vrot.slane %v124_v30, %v2979_v62 }
 0x1b3   :  { %v348_v63 = vpop.f32.mrb[0].mxu1  ;;  %v2974_v1 = vpop.f32.mrb[4].mxu0 }
 0x1b4   :  { %v350_v2 = vpop.f32.mrb[1].mxu1  ;;  %v2099_v32 = vpop.f32.mrb[5].mxu0 }
 0x1b5   :  { %v352_v33 = vpop.f32.mrb[2].mxu1  ;;  %v392_v34 = vpop.f32.mrb[6].mxu0 }
 0x1b6   :  { %v353_v35 = vpop.f32.mrb[3].mxu1  ;;  %v2100_v36 = vpop.f32.mrb[7].mxu0 }
 0x1d3   :  { %v557_v32 = vpop.f32.mrb[4].mxu1  ;;  %v598_v33 = vpop.f32.mrb[8].mxu0 }
 0x1d4   :  { %v604_v34 = vadd.f32 %v557_v32, %v348_v63  ;;  %v559_v35 = vpop.f32.mrb[5].mxu1  ;;  %v2119_v36 = vpop.f32.mrb[9].mxu0 }
 0x1d5   :  { %v605_v37 = vadd.f32 %v559_v35, %v350_v2  ;;  %v561_v25 = vpop.f32.mrb[6].mxu1  ;;  %v601_v29 = vpop.f32.mrb[10].mxu0 }
 0x1d6   :  { %v617_v27 = vadd.f32 %v2988_v0, %v604_v34  ;;  %v562_v23 = vpop.f32.mrb[7].mxu1  ;;  %v2120_v26 = vpop.f32.mrb[11].mxu0  ;;  %v3495_v25 = vmov 0.0  }
 0x1d7   :  { %v618_v24 = vadd.f32 %v2991_v28, %v605_v37 }
 0x1d8   :  { %v1920_v40 = vmul.f32 -1.442695, %v617_v27  ;;  %v3496_v27 = vmov 0  }
 0x1d9   :  { %v1921_v32 = vmul.f32 -1.442695, %v618_v24  ;;  %v3010_v24 = vld [vmem:[%s3439_s8] ss:$0 sm:$0xff] }
 0x1da   :  { %2440 = vpow2.f32 %v1920_v40  ;;  %v644_v40 = vadd.f32 %v3010_v24, %v598_v33 }
 0x1db   :  { %v692_v62 = vpop.f32.mrb[8].mxu1  ;;  %2442 = vpow2.f32 %v1921_v32 }
 0x1dc   :  { %v693_v20 = vadd.f32 %v2778_v31, %v692_v62  ;;  %v2125_v63 = vpop.f32.mrb[9].mxu1  ;;  %v3020_v62 = vld [vmem:[%s3440_s7] ss:$0 sm:$0xff] }
 0x1dd   :  { %v695_v36 = vpop.f32.mrb[10].mxu1  ;;  %v637_v37 = vadd.f32 %v3020_v62, %v2974_v1 }
 0x1de   :  { %v698_v2 = vmax.f32 %v693_v20, 0.0  ;;  %v2126_v35 = vpop.f32.mrb[11].mxu1 }
 0x1e0   :  { %v699_v30 = vpack.c.bf16 %v698_v2, %v698_v2 }
 0x1e2   :  { %733 = vmatmul.mubr.bf16.vlgmr.msra.gmra.mrb[12].mxu0 %v699_v30  ;;  %2144 = vmatmul.mubr.bf16.vlgmr.msra.gmra.mrb[12].mxu1 %v699_v30 }
 0x1e3   :  { %783 = vmatpush1.bf16.msra.mxu0 %v2784_v38  ;;  %2148 = vmatpush3.bf16.msra.mxu1 %v2789_v39 }
 0x1e4   :  { %v2441_v23 = vpop.eup %2440  ;;  %784 = vmatprep.subr.bf16.mxu0 %v2794_v41  ;;  %2149 = vmatprep.subr.bf16.mxu1 %v3495_v25 }
 0x1e5   :  { %v625_v26 = vadd.f32 1.0, %v2441_v23  ;;  %814 = vmatprep.mubr.bf16.mxu0 %v3496_v27  ;;  %2163 = vmatprep.mubr.msk.bf16.mxu1 %vm2522_vm1, %v3495_v25  ;;  %v2443_v20 = vpop.eup %2442 }
 0x1e6   :  { %v626_v29 = vadd.f32 1.0, %v2443_v20  ;;  %v3497_v20 = vld [vmem:[#allocation6_spill] sm:$0xff] }
 0x1e7   :  { %2444 = vrcp.f32 %v625_v26  ;;  %785 = vmatpush1.bf16.msra.mxu0 %v2800_v42  ;;  %2150 = vmatpush3.bf16.msra.mxu1 %v2806_v43  ;;  %v889_v26 = vpop.permute.xlu0 %888 }
 0x1e8   :  { %786 = vmatprep.subr.bf16.mxu0 %v2812_v44  ;;  %2151 = vmatprep.subr.bf16.mxu1 %v3495_v25  ;;  %2446 = vrcp.f32 %v626_v29  ;;  %v3498_v29 = vld [vmem:[#allocation10_spill] sm:$0xff] }
 0x1eb   :  { %787 = vmatpush1.bf16.msra.mxu0 %v2822_v45  ;;  %2152 = vmatpush3.bf16.msra.mxu1 %v2828_v46 }
 0x1ec   :  { %788 = vmatprep.subr.bf16.mxu0 %v2834_v47  ;;  %2153 = vmatprep.subr.bf16.mxu1 %v3495_v25 }
 0x1ef   :  { %789 = vmatpush1.bf16.msra.mxu0 %v2841_v48  ;;  %2154 = vmatpush3.bf16.msra.mxu1 %v2847_v49 }
 0x1f0   :  { %790 = vmatprep.subr.bf16.mxu0 %v2853_v50  ;;  %2155 = vmatprep.subr.bf16.mxu1 %v3495_v25 }
 0x1f1   :  { %v2445_v34 = vpop.eup %2444 }
 0x1f2   :  { %v645_v63 = vmul.f32 %v2445_v34, %v644_v40  ;;  %v2447_v1 = vpop.eup %2446  ;;  %v3499_v40 = vld [vmem:[#allocation12_spill] sm:$0xff]  ;;  %v3500_v34 = vld [vmem:[#allocation9_spill] sm:$0xff] }
 0x1f3   :  { %791 = vmatpush1.bf16.msra.mxu0 %v2860_v51  ;;  %2156 = vmatpush3.bf16.msra.mxu1 %v2866_v52  ;;  %v648_v32 = vsub.f32 1.0, %v2447_v1  ;;  %v650_v35 = vmul.f32 0.0, %v2447_v1  ;;  %v3504_v1 = vld [vmem:[#allocation14_spill] sm:$0xff] }
 0x1f4   :  { %v646_v33 = vadd.f32 %v645_v63, %v637_v37  ;;  %792 = vmatprep.subr.bf16.mxu0 %v2872_v53  ;;  %2157 = vmatprep.subr.bf16.mxu1 %v3495_v25  ;;  %v3501_v37 = vld [vmem:[#allocation13_spill] sm:$0xff]  ;;  %v3502_v63 = vld [vmem:[#allocation15_spill] sm:$0xff] }
 0x1f6   :  { %2448 = vtanh.f32 %v646_v33  ;;  %v3503_v33 = vld [vmem:[#allocation11_spill] sm:$0xff] }
 0x1f7   :  { %793 = vmatpush1.bf16.msra.mxu0 %v2879_v54  ;;  %2158 = vmatpush3.bf16.msra.mxu1 %v2885_v55 }
 0x1f8   :  { %794 = vmatprep.subr.bf16.mxu0 %v2891_v56  ;;  %2159 = vmatprep.subr.bf16.mxu1 %v3495_v25 }
 0x1fb   :  { %795 = vmatpush1.bf16.msra.mxu0 %v2898_v57  ;;  %2160 = vmatpush3.bf16.msra.mxu1 %v2904_v58 }
 0x1fc   :  { %796 = vmatprep.subr.bf16.mxu0 %v2910_v59  ;;  %2161 = vmatprep.subr.bf16.mxu1 %v3495_v25 }
 0x1ff   :  { %797 = vmatpush1.bf16.msra.mxu0 %v2917_v60  ;;  %2162 = vmatpush3.bf16.msra.mxu1 %v2923_v61 }
 0x200   :  { %v2449_v36 = vpop.eup %2448  ;;  %2167 = vmatprep.subr.bf16.mxu0 %v3495_v25  ;;  %935 = vmatprep.subr.bf16.mxu1 %v2611_v5 }
 0x201   :  { %v649_v2 = vmul.f32 %v2449_v36, %v648_v32 }
 0x203   :  { %v3044_v30 = vadd.f32 %v650_v35, %v649_v2 }
 0x205   :  { %v781_v23 = vpack.c.bf16 %v3044_v30, %v3044_v30 }
 0x207   :  { %815 = vmatmul.mubr.bf16.vlgmr.msra.gmra.mrb[16].mxu0 %v781_v23  ;;  %2164 = vmatmul.mubr.bf16.vlgmr.msra.gmra.mrb[16].mxu1 %v781_v23 }
 0x208   :  { %2168 = vmatpush3.bf16.msra.mxu0 %v2604_v3  ;;  %2169 = vmatprep.mubr.msk.bf16.mxu0 %vm2522_vm1, %v3495_v25 }
 0x209   :  { %2173 = vmatprep.subr.bf16.mxu0 %v3495_v25  ;;  %936 = vmatpush1.bf16.msra.mxu1 %v2616_v6 }
 0x20a   :  { %937 = vmatprep.subr.bf16.mxu1 %v2629_v8  ;;  %967 = vmatprep.mubr.bf16.mxu1 %v3496_v27 }
 0x20d   :  { %938 = vmatpush1.bf16.msra.mxu1 %v2636_v9 }
 0x20e   :  { %939 = vmatprep.subr.bf16.mxu1 %v2650_v11 }
 0x20f   :  { %2170 = vmatmul.mubr.msk.bf16.vlgmr.msra.gmra.mrb[20].mxu0 %vm136_vm2, %v889_v26 }
 0x210   :  { %2174 = vmatpush3.bf16.msra.mxu0 %v2622_v7  ;;  %2189 = vmatprep.mubr.msk.bf16.mxu0 %vm2522_vm1, %v3495_v25 }
 0x211   :  { %2175 = vmatprep.subr.bf16.mxu0 %v3495_v25  ;;  %940 = vmatpush1.bf16.msra.mxu1 %v2659_v12 }
 0x212   :  { %941 = vmatprep.subr.bf16.mxu1 %v2665_v13 }
 0x214   :  { %2176 = vmatpush3.bf16.msra.mxu0 %v2645_v10 }
 0x215   :  { %2177 = vmatprep.subr.bf16.mxu0 %v3495_v25  ;;  %942 = vmatpush1.bf16.msra.mxu1 %v2678_v15 }
 0x216   :  { %943 = vmatprep.subr.bf16.mxu1 %v2684_v16 }
 0x218   :  { %2178 = vmatpush3.bf16.msra.mxu0 %v2671_v14 }
 0x219   :  { %2179 = vmatprep.subr.bf16.mxu0 %v3495_v25  ;;  %944 = vmatpush1.bf16.msra.mxu1 %v2696_v18 }
 0x21a   :  { %945 = vmatprep.subr.bf16.mxu1 %v2702_v19 }
 0x21c   :  { %2180 = vmatpush3.bf16.msra.mxu0 %v2690_v17 }
 0x21d   :  { %2181 = vmatprep.subr.bf16.mxu0 %v3495_v25  ;;  %946 = vmatpush1.bf16.msra.mxu1 %v2716_v21 }
 0x21e   :  { %947 = vmatprep.subr.bf16.mxu1 %v2722_v22 }
 0x220   :  { %2182 = vmatpush3.bf16.msra.mxu0 %v3497_v20 }
 0x221   :  { %2183 = vmatprep.subr.bf16.mxu0 %v3495_v25  ;;  %948 = vmatpush1.bf16.msra.mxu1 %v3498_v29 }
 0x222   :  { %949 = vmatprep.subr.bf16.mxu1 %v3499_v40 }
 0x224   :  { %2184 = vmatpush3.bf16.msra.mxu0 %v3500_v34 }
 0x225   :  { %2185 = vmatprep.subr.bf16.mxu0 %v3495_v25  ;;  %950 = vmatpush1.bf16.msra.mxu1 %v3501_v37 }
 0x226   :  { %1017 = vmatprep.subr.bf16.mxu1 %v3502_v63 }
 0x228   :  { %2186 = vmatpush3.bf16.msra.mxu0 %v3503_v33 }
 0x229   :  { %2187 = vmatprep.subr.bf16.mxu0 %v3495_v25 }
 0x22c   :  { %2188 = vmatpush3.bf16.msra.mxu0 %v3504_v1 }
 0x22d   :  { %2193 = vmatprep.subr.bf16.mxu0 %v3495_v25 }
 0x2b5   :  { %v734_v32 = vpop.f32.mrb[12].mxu0  ;;  %v775_v36 = vpop.f32.mrb[12].mxu1 }
 0x2b6   :  { %v736_v2 = vpop.f32.mrb[13].mxu0  ;;  %v2145_v35 = vpop.f32.mrb[13].mxu1 }
 0x2b7   :  { %v738_v23 = vpop.f32.mrb[14].mxu0  ;;  %v778_v26 = vpop.f32.mrb[14].mxu1 }
 0x2b8   :  { %v739_v4 = vpop.f32.mrb[15].mxu0  ;;  %v2146_v34 = vpop.f32.mrb[15].mxu1 }
 0x2da   :  { %v816_v40 = vpop.f32.mrb[16].mxu0  ;;  %v857_v37 = vpop.f32.mrb[16].mxu1 }
 0x2db   :  { %v863_v29 = vadd.f32 %v816_v40, %v734_v32  ;;  %v818_v63 = vpop.f32.mrb[17].mxu0  ;;  %v2165_v20 = vpop.f32.mrb[17].mxu1 }
 0x2dc   :  { %v864_v33 = vadd.f32 %v818_v63, %v736_v2  ;;  %v820_v22 = vpop.f32.mrb[18].mxu0  ;;  %v860_v21 = vpop.f32.mrb[18].mxu1 }
 0x2dd   :  { %v865_v1 = vadd.f32 %v863_v29, %v2988_v0  ;;  %v821_v17 = vpop.f32.mrb[19].mxu0  ;;  %v2166_v19 = vpop.f32.mrb[19].mxu1  ;;  %v880_v21 = vadd.f32 %v3010_v24, %v857_v37  ;;  %v879_v29 = vadd.f32 %v3020_v62, %v775_v36 }
 0x2de   :  { %v866_v14 = vadd.f32 %v864_v33, %v2991_v28 }
 0x2df   :  { %v1925_v18 = vmul.f32 -1.442695, %v865_v1 }
 0x2e0   :  { %v1926_v23 = vmul.f32 -1.442695, %v866_v14 }
 0x2e1   :  { %2450 = vpow2.f32 %v1925_v18 }
 0x2e2   :  { %v927_v35 = vpop.f32.mrb[20].mxu0  ;;  %2452 = vpow2.f32 %v1926_v23  ;;  %v3517_v23 = vld [vmem:[#allocation11_spill] sm:$0xff] }
 0x2e3   :  { %v928_v4 = vadd.f32 %v2778_v31, %v927_v35  ;;  %v2171_v34 = vpop.f32.mrb[21].mxu0 }
 0x2e4   :  { %v930_v26 = vpop.f32.mrb[22].mxu0 }
 0x2e5   :  { %v933_v40 = vmax.f32 %v928_v4, 0.0  ;;  %v2172_v32 = vpop.f32.mrb[23].mxu0  ;;  %v3518_v26 = vld [vmem:[#allocation14_spill] sm:$0xff] }
 0x2e7   :  { %v934_v20 = vpack.c.bf16 %v933_v40, %v933_v40 }
 0x2e9   :  { %968 = vmatmul.mubr.bf16.vlgmr.msra.gmra.mrb[20].mxu1 %v934_v20  ;;  %2190 = vmatmul.mubr.bf16.vlgmr.msra.gmra.mrb[24].mxu0 %v934_v20 }
 0x2ea   :  { %1018 = vmatpush1.bf16.msra.mxu1 %v2784_v38  ;;  %2194 = vmatpush3.bf16.msra.mxu0 %v2789_v39 }
 0x2eb   :  { %v2451_v17 = vpop.eup %2450  ;;  %1019 = vmatprep.subr.bf16.mxu1 %v2794_v41  ;;  %2195 = vmatprep.subr.bf16.mxu0 %v3495_v25 }
 0x2ec   :  { %v873_v18 = vadd.f32 1.0, %v2451_v17  ;;  %1049 = vmatprep.mubr.bf16.mxu1 %v3496_v27  ;;  %2209 = vmatprep.mubr.msk.bf16.mxu0 %vm2522_vm1, %v3495_v25  ;;  %v2453_v14 = vpop.eup %2452 }
 0x2ed   :  { %v874_v19 = vadd.f32 1.0, %v2453_v14 }
 0x2ee   :  { %2454 = vrcp.f32 %v873_v18  ;;  %1020 = vmatpush1.bf16.msra.mxu1 %v2800_v42  ;;  %2196 = vmatpush3.bf16.msra.mxu0 %v2806_v43 }
 0x2ef   :  { %1021 = vmatprep.subr.bf16.mxu1 %v2812_v44  ;;  %2197 = vmatprep.subr.bf16.mxu0 %v3495_v25  ;;  %2456 = vrcp.f32 %v874_v19 }
 0x2f2   :  { %1022 = vmatpush1.bf16.msra.mxu1 %v2822_v45  ;;  %2198 = vmatpush3.bf16.msra.mxu0 %v2828_v46 }
 0x2f3   :  { %1023 = vmatprep.subr.bf16.mxu1 %v2834_v47  ;;  %2199 = vmatprep.subr.bf16.mxu0 %v3495_v25 }
 0x2f6   :  { %1024 = vmatpush1.bf16.msra.mxu1 %v2841_v48  ;;  %2200 = vmatpush3.bf16.msra.mxu0 %v2847_v49 }
 0x2f7   :  { %1025 = vmatprep.subr.bf16.mxu1 %v2853_v50  ;;  %2201 = vmatprep.subr.bf16.mxu0 %v3495_v25 }
 0x2f8   :  { %v2455_v22 = vpop.eup %2454 }
 0x2f9   :  { %v881_v63 = vmul.f32 %v2455_v22, %v880_v21  ;;  %v2457_v37 = vpop.eup %2456 }
 0x2fa   :  { %1026 = vmatpush1.bf16.msra.mxu1 %v2860_v51  ;;  %2202 = vmatpush3.bf16.msra.mxu0 %v2866_v52  ;;  %v884_v1 = vsub.f32 1.0, %v2457_v37  ;;  %v886_v35 = vmul.f32 %v2457_v37, %v3044_v30  ;;  %v3516_v30 = vld [vmem:[#allocation15_spill] sm:$0xff] }
 0x2fb   :  { %v882_v33 = vadd.f32 %v881_v63, %v879_v29  ;;  %1027 = vmatprep.subr.bf16.mxu1 %v2872_v53  ;;  %2203 = vmatprep.subr.bf16.mxu0 %v3495_v25 }
 0x2fd   :  { %2458 = vtanh.f32 %v882_v33 }
 0x2fe   :  { %1028 = vmatpush1.bf16.msra.mxu1 %v2879_v54  ;;  %2204 = vmatpush3.bf16.msra.mxu0 %v2885_v55 }
 0x2ff   :  { %1029 = vmatprep.subr.bf16.mxu1 %v2891_v56  ;;  %2205 = vmatprep.subr.bf16.mxu0 %v3495_v25 }
 0x302   :  { %1030 = vmatpush1.bf16.msra.mxu1 %v2898_v57  ;;  %2206 = vmatpush3.bf16.msra.mxu0 %v2904_v58 }
 0x303   :  { %1031 = vmatprep.subr.bf16.mxu1 %v2910_v59  ;;  %2207 = vmatprep.subr.bf16.mxu0 %v3495_v25 }
 0x306   :  { %1032 = vmatpush1.bf16.msra.mxu1 %v2917_v60  ;;  %2208 = vmatpush3.bf16.msra.mxu0 %v2923_v61 }
 0x307   :  { %v2459_v36 = vpop.eup %2458  ;;  %2213 = vmatprep.subr.bf16.mxu1 %v3495_v25  ;;  %1170 = vmatprep.subr.bf16.mxu0 %v2611_v5  ;;  %v1124_v5 = vpop.permute.xlu1 %1123 }
 0x308   :  { %v885_v2 = vmul.f32 %v2459_v36, %v884_v1 }
 0x30a   :  { %v3129_v4 = vadd.f32 %v886_v35, %v885_v2 }
 0x30c   :  { %v1016_v34 = vpack.c.bf16 %v3129_v4, %v3129_v4 }
 0x30e   :  { %1050 = vmatmul.mubr.bf16.vlgmr.msra.gmra.mrb[24].mxu1 %v1016_v34  ;;  %2210 = vmatmul.mubr.bf16.vlgmr.msra.gmra.mrb[28].mxu0 %v1016_v34 }
 0x30f   :  { %2214 = vmatpush3.bf16.msra.mxu1 %v2604_v3  ;;  %2215 = vmatprep.mubr.msk.bf16.mxu1 %vm2522_vm1, %v3495_v25  ;;  %v3505_v3 = vld [vmem:[#allocation2_spill] sm:$0xff] }
 0x310   :  { %2219 = vmatprep.subr.bf16.mxu1 %v3495_v25  ;;  %1171 = vmatpush1.bf16.msra.mxu0 %v2616_v6  ;;  %v3506_v6 = vld [vmem:[#allocation4_spill] sm:$0xff] }
 0x311   :  { %1172 = vmatprep.subr.bf16.mxu0 %v2629_v8  ;;  %1202 = vmatprep.mubr.bf16.mxu0 %v3496_v27  ;;  %v3508_v8 = vld [vmem:[#allocation3_spill] sm:$0xff] }
 0x314   :  { %1173 = vmatpush1.bf16.msra.mxu0 %v2636_v9  ;;  %v3509_v9 = vld [vmem:[#allocation7_spill] sm:$0xff] }
 0x315   :  { %1174 = vmatprep.subr.bf16.mxu0 %v2650_v11  ;;  %v3511_v11 = vld [vmem:[#allocation6_spill] sm:$0xff] }
 0x316   :  { %2216 = vmatmul.mubr.msk.bf16.vlgmr.msra.gmra.mrb[28].mxu1 %vm136_vm2, %v1124_v5 }
 0x317   :  { %2220 = vmatpush3.bf16.msra.mxu1 %v2622_v7  ;;  %2235 = vmatprep.mubr.msk.bf16.mxu1 %vm2522_vm1, %v3495_v25  ;;  %v3507_v7 = vld [vmem:[#allocation5_spill] sm:$0xff] }
 0x318   :  { %2221 = vmatprep.subr.bf16.mxu1 %v3495_v25  ;;  %1175 = vmatpush1.bf16.msra.mxu0 %v2659_v12  ;;  %v3512_v12 = vld [vmem:[#allocation10_spill] sm:$0xff] }
 0x319   :  { %1176 = vmatprep.subr.bf16.mxu0 %v2665_v13  ;;  %v3513_v13 = vld [vmem:[#allocation12_spill] sm:$0xff] }
 0x31b   :  { %2222 = vmatpush3.bf16.msra.mxu1 %v2645_v10  ;;  %v3510_v10 = vld [vmem:[#allocation8_spill] sm:$0xff] }
 0x31c   :  { %2223 = vmatprep.subr.bf16.mxu1 %v3495_v25  ;;  %1177 = vmatpush1.bf16.msra.mxu0 %v2678_v15  ;;  %v3514_v15 = vld [vmem:[#allocation9_spill] sm:$0xff] }
 0x31d   :  { %1178 = vmatprep.subr.bf16.mxu0 %v2684_v16  ;;  %v3515_v16 = vld [vmem:[#allocation13_spill] sm:$0xff] }
 0x31f   :  { %2224 = vmatpush3.bf16.msra.mxu1 %v3505_v3 }
 0x320   :  { %2225 = vmatprep.subr.bf16.mxu1 %v3495_v25  ;;  %1179 = vmatpush1.bf16.msra.mxu0 %v3506_v6 }
 0x321   :  { %1180 = vmatprep.subr.bf16.mxu0 %v3507_v7 }
 0x323   :  { %2226 = vmatpush3.bf16.msra.mxu1 %v3508_v8 }
 0x324   :  { %2227 = vmatprep.subr.bf16.mxu1 %v3495_v25  ;;  %1181 = vmatpush1.bf16.msra.mxu0 %v3509_v9 }
 0x325   :  { %1182 = vmatprep.subr.bf16.mxu0 %v3510_v10 }
 0x327   :  { %2228 = vmatpush3.bf16.msra.mxu1 %v3511_v11 }
 0x328   :  { %2229 = vmatprep.subr.bf16.mxu1 %v3495_v25  ;;  %1183 = vmatpush1.bf16.msra.mxu0 %v3512_v12 }
 0x329   :  { %1184 = vmatprep.subr.bf16.mxu0 %v3513_v13 }
 0x32b   :  { %2230 = vmatpush3.bf16.msra.mxu1 %v3514_v15 }
 0x32c   :  { %2231 = vmatprep.subr.bf16.mxu1 %v3495_v25  ;;  %1185 = vmatpush1.bf16.msra.mxu0 %v3515_v16 }
 0x32d   :  { %1252 = vmatprep.subr.bf16.mxu0 %v3516_v30 }
 0x32f   :  { %2232 = vmatpush3.bf16.msra.mxu1 %v3517_v23 }
 0x330   :  { %2233 = vmatprep.subr.bf16.mxu1 %v3495_v25 }
 0x333   :  { %2234 = vmatpush3.bf16.msra.mxu1 %v3518_v26 }
 0x334   :  { %2239 = vmatprep.subr.bf16.mxu1 %v3495_v25 }
 0x3bc   :  { %v969_v40 = vpop.f32.mrb[20].mxu1  ;;  %v1010_v32 = vpop.f32.mrb[24].mxu0 }
 0x3bd   :  { %v971_v20 = vpop.f32.mrb[21].mxu1  ;;  %v2191_v17 = vpop.f32.mrb[25].mxu0 }
 0x3be   :  { %v973_v18 = vpop.f32.mrb[22].mxu1  ;;  %v1013_v14 = vpop.f32.mrb[26].mxu0  ;;  %v1114_v17 = vadd.f32 %v3020_v62, %v1010_v32 }
 0x3bf   :  { %v974_v19 = vpop.f32.mrb[23].mxu1  ;;  %v2192_v21 = vpop.f32.mrb[27].mxu0 }
 0x3e1   :  { %v1051_v22 = vpop.f32.mrb[24].mxu1  ;;  %v1092_v29 = vpop.f32.mrb[28].mxu0 }
 0x3e2   :  { %v1098_v63 = vadd.f32 %v1051_v22, %v969_v40  ;;  %v1053_v33 = vpop.f32.mrb[25].mxu1  ;;  %v2211_v37 = vpop.f32.mrb[29].mxu0  ;;  %v1115_v40 = vadd.f32 %v3010_v24, %v1092_v29 }
 0x3e3   :  { %v1099_v1 = vadd.f32 %v1053_v33, %v971_v20  ;;  %v1055_v36 = vpop.f32.mrb[26].mxu1  ;;  %v1095_v2 = vpop.f32.mrb[30].mxu0 }
 0x3e4   :  { %v1100_v35 = vadd.f32 %v1098_v63, %v2988_v0  ;;  %v1056_v34 = vpop.f32.mrb[27].mxu1  ;;  %v2212_v5 = vpop.f32.mrb[31].mxu0 }
 0x3e5   :  { %v1101_v6 = vadd.f32 %v1099_v1, %v2991_v28 }
 0x3e6   :  { %v1928_v3 = vmul.f32 -1.442695, %v1100_v35 }
 0x3e7   :  { %v1929_v10 = vmul.f32 -1.442695, %v1101_v6 }
 0x3e8   :  { %2460 = vpow2.f32 %v1928_v3 }
 0x3e9   :  { %v1162_v7 = vpop.f32.mrb[28].mxu1  ;;  %2462 = vpow2.f32 %v1929_v10  ;;  %v3278_v10 = vld [vmem:[%s3441_s10 + $0x8] sm:$0xff]  }
 0x3ea   :  { %v1163_v8 = vadd.f32 %v2778_v31, %v1162_v7  ;;  %v2217_v9 = vpop.f32.mrb[29].mxu1 }
 0x3eb   :  { %v1165_v11 = vpop.f32.mrb[30].mxu1 }
 0x3ec   :  { %v1168_v12 = vmax.f32 %v1163_v8, 0.0  ;;  %v2218_v13 = vpop.f32.mrb[31].mxu1  ;;  %v3287_v11 = vld [vmem:[%s3441_s10 + $0x10] sm:$0xff]  }
 0x3ed   :  { %v3303_v13 = vld [vmem:[%s3441_s10 + $0x20] sm:$0xff]  }
 0x3ee   :  { %v1169_v15 = vpack.c.bf16 %v1168_v12, %v1168_v12  ;;  %v3296_v12 = vld [vmem:[%s3441_s10 + $0x18] sm:$0xff]  }
 0x3f0   :  { %1203 = vmatmul.mubr.bf16.vlgmr.msra.gmra.mrb[32].mxu0 %v1169_v15  ;;  %2236 = vmatmul.mubr.bf16.vlgmr.msra.gmra.mrb[32].mxu1 %v1169_v15  ;;  %v3312_v15 = vld [vmem:[%s3441_s10 + $0x28] sm:$0xff]  }
 0x3f1   :  { %1253 = vmatpush1.bf16.msra.mxu0 %v2784_v38  ;;  %2240 = vmatpush3.bf16.msra.mxu1 %v2789_v39 }
 0x3f2   :  { %v2461_v16 = vpop.eup %2460  ;;  %1254 = vmatprep.subr.bf16.mxu0 %v2794_v41  ;;  %2241 = vmatprep.subr.bf16.mxu1 %v3495_v25 }
 0x3f3   :  { %v1108_v23 = vadd.f32 1.0, %v2461_v16  ;;  %1284 = vmatprep.mubr.bf16.mxu0 %v3496_v27  ;;  %2255 = vmatprep.mubr.msk.bf16.mxu1 %vm2522_vm1, %v3495_v25  ;;  %v2463_v31 = vpop.eup %2462  ;;  %v3321_v16 = vld [vmem:[%s3441_s10 + $0x30] sm:$0xff]  }
 0x3f4   :  { %v1109_v26 = vadd.f32 1.0, %v2463_v31  ;;  %v1443_v31 = vld [vmem:[%s3442_s9] sm:$0xff] }
 0x3f5   :  { %2464 = vrcp.f32 %v1108_v23  ;;  %1255 = vmatpush1.bf16.msra.mxu0 %v2800_v42  ;;  %2242 = vmatpush3.bf16.msra.mxu1 %v2806_v43  ;;  %v3330_v23 = vld [vmem:[%s3441_s10 + $0x38] sm:$0xff]  }
 0x3f6   :  { %1256 = vmatprep.subr.bf16.mxu0 %v2812_v44  ;;  %2243 = vmatprep.subr.bf16.mxu1 %v3495_v25  ;;  %2466 = vrcp.f32 %v1109_v26  ;;  %v3519_v26 = vld [vmem:[#allocation16_spill] sm:$0xff] }
 0x3f9   :  { %1257 = vmatpush1.bf16.msra.mxu0 %v2822_v45  ;;  %2244 = vmatpush3.bf16.msra.mxu1 %v2828_v46 }
 0x3fa   :  { %1258 = vmatprep.subr.bf16.mxu0 %v2834_v47  ;;  %2245 = vmatprep.subr.bf16.mxu1 %v3495_v25 }
 0x3fd   :  { %1259 = vmatpush1.bf16.msra.mxu0 %v2841_v48  ;;  %2246 = vmatpush3.bf16.msra.mxu1 %v2847_v49 }
 0x3fe   :  { %1260 = vmatprep.subr.bf16.mxu0 %v2853_v50  ;;  %2247 = vmatprep.subr.bf16.mxu1 %v3495_v25 }
 0x3ff   :  { %v2465_v20 = vpop.eup %2464 }
 0x400   :  { %v1116_v18 = vmul.f32 %v2465_v20, %v1115_v40  ;;  %v2467_v32 = vpop.eup %2466  ;;  %v3342_v40 = vsub.s32 2, %v3519_v26  ;;  %v3345_v20 = vsub.s32 3, %v3519_v26 }
 0x401   :  { %1261 = vmatpush1.bf16.msra.mxu0 %v2860_v51  ;;  %2248 = vmatpush3.bf16.msra.mxu1 %v2866_v52  ;;  %v1119_v19 = vsub.f32 1.0, %v2467_v32  ;;  %v1121_v29 = vmul.f32 %v2467_v32, %v3129_v4  ;;  %v1597_v32 = vsub.s32 5, %v3519_v26 }
 0x402   :  { %v1117_v14 = vadd.f32 %v1116_v18, %v1114_v17  ;;  %1262 = vmatprep.subr.bf16.mxu0 %v2872_v53  ;;  %2249 = vmatprep.subr.bf16.mxu1 %v3495_v25  ;;  %v3520_v17 = vld [vmem:[#allocation17_spill] sm:$0xff] }
 0x403   :  { %v1455_v18 = vrot.slane %v1443_v31, %v3520_v17 }
 0x404   :  { %2468 = vtanh.f32 %v1117_v14  ;;  %v1458_v14 = vsub.s32 4, %v3519_v26 }
 0x405   :  { %1263 = vmatpush1.bf16.msra.mxu0 %v2879_v54  ;;  %2250 = vmatpush3.bf16.msra.mxu1 %v2885_v55 }
 0x406   :  { %1264 = vmatprep.subr.bf16.mxu0 %v2891_v56  ;;  %2251 = vmatprep.subr.bf16.mxu1 %v3495_v25 }
 0x409   :  { %1265 = vmatpush1.bf16.msra.mxu0 %v2898_v57  ;;  %2252 = vmatpush3.bf16.msra.mxu1 %v2904_v58 }
 0x40a   :  { %1266 = vmatprep.subr.bf16.mxu0 %v2910_v59  ;;  %2253 = vmatprep.subr.bf16.mxu1 %v3495_v25 }
 0x40d   :  { %1267 = vmatpush1.bf16.msra.mxu0 %v2917_v60  ;;  %2254 = vmatpush3.bf16.msra.mxu1 %v2923_v61 }
 0x40e   :  { %v2469_v21 = vpop.eup %2468  ;;  %1359 = vmatprep.subr.bf16.mxu0 %v3516_v30  ;;  %2259 = vmatprep.subr.bf16.mxu1 %v3495_v25 }
 0x40f   :  { %v1120_v22 = vmul.f32 %v2469_v21, %v1119_v19  ;;  %v3521_v19 = vld [vmem:[#allocation18_spill] sm:$0xff] }
 0x410   :  { %v1594_v21 = vrot.slane %v1443_v31, %v3521_v19 }
 0x411   :  { %v3214_v63 = vadd.f32 %v1121_v29, %v1120_v22  ;;  %v1679_v22 = vrot.slane %v1443_v31, %v3342_v40  ;;  %v1764_v29 = vrot.slane %v1443_v31, %v3345_v20 }
 0x413   :  { %v1251_v33 = vpack.c.bf16 %v3214_v63, %v3214_v63 }
 0x415   :  { %1285 = vmatmul.mubr.bf16.vlgmr.msra.gmra.mrb[36].mxu0 %v1251_v33  ;;  %2256 = vmatmul.mubr.bf16.vlgmr.msra.gmra.mrb[36].mxu1 %v1251_v33  ;;  %v1682_v33 = vsub.s32 6, %v3519_v26 }
 0x416   :  { %1360 = vmatpush1.bf16.msra.mxu0 %v2784_v38  ;;  %2260 = vmatpush3.bf16.msra.mxu1 %v2789_v39 }
 0x417   :  { %1361 = vmatprep.subr.bf16.mxu0 %v2794_v41  ;;  %2261 = vmatprep.subr.bf16.mxu1 %v3495_v25 }
 0x418   :  { %1391 = vmatprep.mubr.bf16.mxu0 %v3496_v27  ;;  %2275 = vmatprep.mubr.msk.bf16.mxu1 %vm2522_vm1, %v3495_v25 }
 0x41a   :  { %1362 = vmatpush1.bf16.msra.mxu0 %v2800_v42  ;;  %2262 = vmatpush3.bf16.msra.mxu1 %v2806_v43 }
 0x41b   :  { %1363 = vmatprep.subr.bf16.mxu0 %v2812_v44  ;;  %2263 = vmatprep.subr.bf16.mxu1 %v3495_v25 }
 0x41e   :  { %1364 = vmatpush1.bf16.msra.mxu0 %v2822_v45  ;;  %2264 = vmatpush3.bf16.msra.mxu1 %v2828_v46 }
 0x41f   :  { %1365 = vmatprep.subr.bf16.mxu0 %v2834_v47  ;;  %2265 = vmatprep.subr.bf16.mxu1 %v3495_v25 }
 0x422   :  { %1366 = vmatpush1.bf16.msra.mxu0 %v2841_v48  ;;  %2266 = vmatpush3.bf16.msra.mxu1 %v2847_v49 }
 0x423   :  { %1367 = vmatprep.subr.bf16.mxu0 %v2853_v50  ;;  %2267 = vmatprep.subr.bf16.mxu1 %v3495_v25 }
 0x426   :  { %1368 = vmatpush1.bf16.msra.mxu0 %v2860_v51  ;;  %2268 = vmatpush3.bf16.msra.mxu1 %v2866_v52 }
 0x427   :  { %1369 = vmatprep.subr.bf16.mxu0 %v2872_v53  ;;  %2269 = vmatprep.subr.bf16.mxu1 %v3495_v25 }
 0x42a   :  { %1370 = vmatpush1.bf16.msra.mxu0 %v2879_v54  ;;  %2270 = vmatpush3.bf16.msra.mxu1 %v2885_v55 }
 0x42b   :  { %1371 = vmatprep.subr.bf16.mxu0 %v2891_v56  ;;  %2271 = vmatprep.subr.bf16.mxu1 %v3495_v25 }
 0x42e   :  { %1372 = vmatpush1.bf16.msra.mxu0 %v2898_v57  ;;  %2272 = vmatpush3.bf16.msra.mxu1 %v2904_v58 }
 0x42f   :  { %1373 = vmatprep.subr.bf16.mxu0 %v2910_v59  ;;  %2273 = vmatprep.subr.bf16.mxu1 %v3495_v25 }
 0x432   :  { %1374 = vmatpush1.bf16.msra.mxu0 %v2917_v60  ;;  %2274 = vmatpush3.bf16.msra.mxu1 %v2923_v61 }
 0x433   :  { %2279 = vmatprep.subr.bf16.mxu0 %v3495_v25  ;;  %2299 = vmatprep.subr.bf16.mxu1 %v3495_v25 }
 0x4c3   :  { %v1204_v38 = vpop.f32.mrb[32].mxu0  ;;  %v1245_v39 = vpop.f32.mrb[32].mxu1 }
 0x4c4   :  { %v1206_v41 = vpop.f32.mrb[33].mxu0  ;;  %v2237_v42 = vpop.f32.mrb[33].mxu1  ;;  %v1349_v36 = vadd.f32 %v3020_v62, %v1245_v39  ;;  %v1767_v39 = vsub.s32 7, %v3519_v26 }
 0x4c5   :  { %v1208_v43 = vpop.f32.mrb[34].mxu0  ;;  %v1248_v44 = vpop.f32.mrb[34].mxu1  ;;  %v1465_v42 = vrot.slane %v1455_v18, %v3520_v17 }
 0x4c6   :  { %v1209_v45 = vpop.f32.mrb[35].mxu0  ;;  %v2238_v46 = vpop.f32.mrb[35].mxu1  ;;  %v1459_v44 = vrot.slane %v1443_v31, %v1458_v14 }
 0x4c7   :  { %v1598_v45 = vrot.slane %v1443_v31, %v1597_v32 }
 0x4e8   :  { %v1286_v47 = vpop.f32.mrb[36].mxu0  ;;  %v1327_v48 = vpop.f32.mrb[36].mxu1 }
 0x4e9   :  { %v1333_v49 = vadd.f32 %v1286_v47, %v1204_v38  ;;  %v1288_v50 = vpop.f32.mrb[37].mxu0  ;;  %v2257_v51 = vpop.f32.mrb[37].mxu1  ;;  %v1350_v37 = vadd.f32 %v3010_v24, %v1327_v48  ;;  %v3269_v24 = vld [vmem:[%s3441_s10] sm:$0xff]   ;;  %v1441_v38 = vld [vmem:[%s3443_s1 + $0x8] sm:$0xff]  ;;  %v1604_v47 = vrot.slane %v1594_v21, %v3521_v19  ;;  %v1689_v48 = vrot.slane %v1679_v22, %v3342_v40 }
 0x4ea   :  { %v1334_v52 = vadd.f32 %v1288_v50, %v1206_v41  ;;  %v1290_v53 = vpop.f32.mrb[38].mxu0  ;;  %v1330_v54 = vpop.f32.mrb[38].mxu1 }
 0x4eb   :  { %v1335_v55 = vadd.f32 %v1333_v49, %v2988_v0  ;;  %v1291_v56 = vpop.f32.mrb[39].mxu0  ;;  %v2258_v57 = vpop.f32.mrb[39].mxu1  ;;  %v1774_v49 = vrot.slane %v1764_v29, %v3345_v20  ;;  %v1683_v53 = vrot.slane %v1443_v31, %v1682_v33 }
 0x4ec   :  { %v1336_v59 = vadd.f32 %v1334_v52, %v2991_v28  ;;  %v1768_v57 = vrot.slane %v1443_v31, %v1767_v39  ;;  %v1442_v39 = vld [vmem:[%s3443_s1 + $0x10] sm:$0xff] }
 0x4ed   :  { %v1931_v58 = vmul.f32 -1.442695, %v1335_v55 }
 0x4ee   :  { %v1932_v60 = vmul.f32 -1.442695, %v1336_v59 }
 0x4ef   :  { %2470 = vpow2.f32 %v1931_v58 }
 0x4f0   :  { %2472 = vpow2.f32 %v1932_v60 }
 0x4f9   :  { %v2471_v61 = vpop.eup %2470 }
 0x4fa   :  { %v1343_v27 = vadd.f32 1.0, %v2471_v61  ;;  %v2473_v4 = vpop.eup %2472  ;;  %v1469_v61 = vrot.slane %v1459_v44, %v3520_v17 }
 0x4fb   :  { %v1344_v30 = vadd.f32 1.0, %v2473_v4 }
 0x4fc   :  { %2474 = vrcp.f32 %v1343_v27  ;;  %v1608_v27 = vrot.slane %v1598_v45, %v3521_v19  ;;  %v1449_v45 = vadd.f32 %v3020_v62, %v1442_v39 }
 0x4fd   :  { %2476 = vrcp.f32 %v1344_v30 }
 0x506   :  { %v2475_v1 = vpop.eup %2474 }
 0x507   :  { %v1351_v2 = vmul.f32 %v2475_v1, %v1350_v37  ;;  %v2477_v34 = vpop.eup %2476 }
 0x508   :  { %v1354_v5 = vsub.f32 1.0, %v2477_v34  ;;  %v1356_v7 = vmul.f32 %v2477_v34, %v3214_v63  ;;  %v1440_v63 = vld [vmem:[%s3443_s1] sm:$0xff] }
 0x509   :  { %v1352_v35 = vadd.f32 %v1351_v2, %v1349_v36  ;;  %v1693_v36 = vrot.slane %v1683_v53, %v3342_v40 }
 0x50b   :  { %2478 = vtanh.f32 %v1352_v35 }
 0x515   :  { %v2479_v3 = vpop.eup %2478 }
 0x516   :  { %v1355_v6 = vmul.f32 %v2479_v3, %v1354_v5 }
 0x518   :  { %v3258_v8 = vadd.f32 %v1356_v7, %v1355_v6 }
 0x51a   :  { %v1358_v9 = vpack.c.bf16 %v3258_v8, %v3258_v8 }
 0x51c   :  { %1392 = vmatmul.mubr.bf16.vlgmr.msra.gmra.mrb[40].mxu0 %v1358_v9  ;;  %2276 = vmatmul.mubr.bf16.vlgmr.msra.gmra.mrb[40].mxu1 %v1358_v9 }
 0x51d   :  { %2295 = vmatprep.mubr.msk.bf16.mxu0 %vm2522_vm1, %v3495_v25  ;;  %2315 = vmatprep.mubr.msk.bf16.mxu1 %vm2522_vm1, %v3495_v25 }
 0x51e   :  { %2280 = vmatpush3.bf16.msra.mxu0 %v3269_v24  ;;  %2300 = vmatpush3.bf16.msra.mxu1 %v3269_v24 }
 0x51f   :  { %2281 = vmatprep.subr.bf16.mxu0 %v3495_v25  ;;  %2301 = vmatprep.subr.bf16.mxu1 %v3495_v25 }
 0x522   :  { %2282 = vmatpush3.bf16.msra.mxu0 %v3278_v10  ;;  %2302 = vmatpush3.bf16.msra.mxu1 %v3278_v10 }
 0x523   :  { %2283 = vmatprep.subr.bf16.mxu0 %v3495_v25  ;;  %2303 = vmatprep.subr.bf16.mxu1 %v3495_v25 }
 0x526   :  { %2284 = vmatpush3.bf16.msra.mxu0 %v3287_v11  ;;  %2304 = vmatpush3.bf16.msra.mxu1 %v3287_v11 }
 0x527   :  { %2285 = vmatprep.subr.bf16.mxu0 %v3495_v25  ;;  %2305 = vmatprep.subr.bf16.mxu1 %v3495_v25 }
 0x52a   :  { %2286 = vmatpush3.bf16.msra.mxu0 %v3296_v12  ;;  %2306 = vmatpush3.bf16.msra.mxu1 %v3296_v12 }
 0x52b   :  { %2287 = vmatprep.subr.bf16.mxu0 %v3495_v25  ;;  %2307 = vmatprep.subr.bf16.mxu1 %v3495_v25 }
 0x52e   :  { %2288 = vmatpush3.bf16.msra.mxu0 %v3303_v13  ;;  %2308 = vmatpush3.bf16.msra.mxu1 %v3303_v13 }
 0x52f   :  { %2289 = vmatprep.subr.bf16.mxu0 %v3495_v25  ;;  %2309 = vmatprep.subr.bf16.mxu1 %v3495_v25 }
 0x532   :  { %2290 = vmatpush3.bf16.msra.mxu0 %v3312_v15  ;;  %2310 = vmatpush3.bf16.msra.mxu1 %v3312_v15 }
 0x533   :  { %2291 = vmatprep.subr.bf16.mxu0 %v3495_v25  ;;  %2311 = vmatprep.subr.bf16.mxu1 %v3495_v25 }
 0x536   :  { %2292 = vmatpush3.bf16.msra.mxu0 %v3321_v16  ;;  %2312 = vmatpush3.bf16.msra.mxu1 %v3321_v16 }
 0x537   :  { %2293 = vmatprep.subr.bf16.mxu0 %v3495_v25  ;;  %2313 = vmatprep.subr.bf16.mxu1 %v3495_v25 }
 0x53a   :  { %2294 = vmatpush3.bf16.msra.mxu0 %v3330_v23  ;;  %2314 = vmatpush3.bf16.msra.mxu1 %v3330_v23 }
 0x53b   :  { %2319 = vmatprep.subr.bf16.mxu0 %v3495_v25  ;;  %2339 = vmatprep.subr.bf16.mxu1 %v3495_v25 }
 0x5ef   :  { %v1393_v41 = vpop.f32.mrb[40].mxu0  ;;  %v3362_v43 = vpop.f32.mrb[40].mxu1 }
 0x5f0   :  { %v1445_v46 = vadd.f32 %v1440_v63, %v1393_v41  ;;  %v1395_v50 = vpop.f32.mrb[41].mxu0  ;;  %v2277_v51 = vpop.f32.mrb[41].mxu1  ;;  %v1444_v41 = vld [vmem:[%s3442_s9 + $0x8] sm:$0xf] }
 0x5f1   :  { %v1446_v52 = vadd.f32 %v1441_v38, %v1395_v50  ;;  %v1397_v54 = vpop.f32.mrb[42].mxu0  ;;  %v1437_v55 = vpop.f32.mrb[42].mxu1  ;;  %v1711_v50 = vrot.slane %v1444_v41, %v3342_v40 }
 0x5f2   :  { %v1447_v56 = vadd.f32 %v1445_v46, %v2988_v0  ;;  %v1398_v58 = vpop.f32.mrb[43].mxu0  ;;  %v2278_v59 = vpop.f32.mrb[43].mxu1  ;;  %v1778_v0 = vrot.slane %v1768_v57, %v3345_v20  ;;  %v1487_v46 = vrot.slane %v1444_v41, %v3520_v17  ;;  %v2520_v54 = vld [vmem:[%s3439_s8] ss:$0 sm:$0xff] }
 0x5f3   :  { %v1448_v60 = vadd.f32 %v1446_v52, %v2991_v28  ;;  %v1796_v52 = vrot.slane %v1444_v41, %v3345_v20  ;;  %v1450_v55 = vadd.f32 %v2520_v54, %v3362_v43 }
 0x5f4   :  { %v1470_v4 = vadd.f32 %v1465_v42, %v1447_v56  ;;  %v1609_v30 = vadd.f32 %v1604_v47, %v1447_v56  ;;  %v1694_v37 = vadd.f32 %v1689_v48, %v1447_v56  ;;  %v1779_v1 = vadd.f32 %v1774_v49, %v1447_v56 }
 0x5f5   :  { %v1471_v3 = vadd.f32 %v1469_v61, %v1448_v60  ;;  %v1610_v6 = vadd.f32 %v1608_v27, %v1448_v60  ;;  %v1695_v28 = vadd.f32 %v1693_v36, %v1448_v60  ;;  %v1780_v7 = vadd.f32 %v1778_v0, %v1448_v60 }
 0x5f6   :  { %v1933_v2 = vmul.f32 -1.442695, %v1470_v4  ;;  %v1944_v35 = vmul.f32 -1.442695, %v1609_v30  ;;  %v1946_v34 = vmul.f32 -1.442695, %v1694_v37  ;;  %v1626_v48 = vrot.slane %v1444_v41, %v3521_v19 }
 0x5f7   :  { %v1948_v5 = vmul.f32 -1.442695, %v1779_v1  ;;  %v1934_v9 = vmul.f32 -1.442695, %v1471_v3  ;;  %v1945_v31 = vmul.f32 -1.442695, %v1610_v6  ;;  %v1488_v56 = vadd.f32 %v1487_v46, %v1449_v45 }
 0x5f8   :  { %2480 = vpow2.f32 %v1933_v2  ;;  %v1947_v26 = vmul.f32 -1.442695, %v1695_v28  ;;  %v1949_v18 = vmul.f32 -1.442695, %v1780_v7  ;;  %v1627_v17 = vadd.f32 %v1626_v48, %v1449_v45 }
 0x5f9   :  { %2482 = vpow2.f32 %v1944_v35  ;;  %v1712_v60 = vadd.f32 %v1711_v50, %v1449_v45  ;;  %v1797_v27 = vadd.f32 %v1796_v52, %v1449_v45 }
 0x5fa   :  { %2484 = vpow2.f32 %v1946_v34 }
 0x5fb   :  { %2486 = vpow2.f32 %v1948_v5 }
 0x5fc   :  { %2488 = vpow2.f32 %v1934_v9 }
 0x5fd   :  { %2490 = vpow2.f32 %v1945_v31 }
 0x5fe   :  { %2492 = vpow2.f32 %v1947_v26 }
 0x5ff   :  { %2494 = vpow2.f32 %v1949_v18 }
 0x602   :  { %v2481_v14 = vpop.eup %2480 }
 0x603   :  { %v2483_v32 = vpop.eup %2482  ;;  %v1478_v21 = vadd.f32 1.0, %v2481_v14 }
 0x604   :  { %v2485_v22 = vpop.eup %2484  ;;  %v1617_v29 = vadd.f32 1.0, %v2483_v32 }
 0x605   :  { %v2487_v63 = vpop.eup %2486  ;;  %2496 = vrcp.f32 %v1478_v21  ;;  %v1702_v33 = vadd.f32 1.0, %v2485_v22 }
 0x606   :  { %2498 = vrcp.f32 %v1617_v29  ;;  %v1787_v38 = vadd.f32 1.0, %v2487_v63  ;;  %v2489_v42 = vpop.eup %2488 }
 0x607   :  { %2500 = vrcp.f32 %v1702_v33  ;;  %v2491_v44 = vpop.eup %2490  ;;  %v1479_v51 = vadd.f32 1.0, %v2489_v42 }
 0x608   :  { %2502 = vrcp.f32 %v1787_v38  ;;  %v2493_v47 = vpop.eup %2492  ;;  %v1618_v53 = vadd.f32 1.0, %v2491_v44 }
 0x609   :  { %v2495_v49 = vpop.eup %2494  ;;  %v1703_v62 = vadd.f32 1.0, %v2493_v47  ;;  %2504 = vrcp.f32 %v1479_v51 }
 0x60a   :  { %v1788_v58 = vadd.f32 1.0, %v2495_v49  ;;  %2506 = vrcp.f32 %v1618_v53 }
 0x60b   :  { %2508 = vrcp.f32 %v1703_v62 }
 0x60c   :  { %2510 = vrcp.f32 %v1788_v58 }
 0x60f   :  { %v2497_v57 = vpop.eup %2496 }
 0x610   :  { %v2499_v59 = vpop.eup %2498  ;;  %v1489_v19 = vmul.f32 %v2497_v57, %v1450_v55 }
 0x611   :  { %v2501_v40 = vpop.eup %2500  ;;  %v1628_v61 = vmul.f32 %v2499_v59, %v1450_v55 }
 0x612   :  { %v2503_v20 = vpop.eup %2502  ;;  %v1490_v4 = vadd.f32 %v1489_v19, %v1488_v56  ;;  %v1713_v30 = vmul.f32 %v2501_v40, %v1450_v55 }
 0x613   :  { %v1629_v37 = vadd.f32 %v1628_v61, %v1627_v17  ;;  %v1798_v1 = vmul.f32 %v2503_v20, %v1450_v55  ;;  %v2505_v2 = vpop.eup %2504 }
 0x614   :  { %2512 = vtanh.f32 %v1490_v4  ;;  %v1714_v43 = vadd.f32 %v1713_v30, %v1712_v60  ;;  %v2507_v35 = vpop.eup %2506  ;;  %v1492_v5 = vsub.f32 1.0, %v2505_v2  ;;  %v1494_v9 = vmul.f32 %v2505_v2, %v3258_v8 }
 0x615   :  { %2514 = vtanh.f32 %v1629_v37  ;;  %v1799_v36 = vadd.f32 %v1798_v1, %v1797_v27  ;;  %v2509_v34 = vpop.eup %2508  ;;  %v1631_v6 = vsub.f32 1.0, %v2507_v35  ;;  %v1633_v14 = vmul.f32 %v2507_v35, %v3258_v8 }
 0x616   :  { %2516 = vtanh.f32 %v1714_v43  ;;  %v2511_v0 = vpop.eup %2510  ;;  %v1716_v31 = vsub.f32 1.0, %v2509_v34  ;;  %v1718_v63 = vmul.f32 %v2509_v34, %v3258_v8 }
 0x617   :  { %2518 = vtanh.f32 %v1799_v36  ;;  %v1801_v32 = vsub.f32 1.0, %v2511_v0  ;;  %v1803_v39 = vmul.f32 %v2511_v0, %v3258_v8 }
 0x61e   :  { %v2513_v3 = vpop.eup %2512 }
 0x61f   :  { %v2515_v28 = vpop.eup %2514  ;;  %v1493_v7 = vmul.f32 %v2513_v3, %v1492_v5 }
 0x620   :  { %v2517_v26 = vpop.eup %2516  ;;  %v1632_v18 = vmul.f32 %v2515_v28, %v1631_v6 }
 0x621   :  { %v2519_v21 = vpop.eup %2518  ;;  %v1495_v22 = vadd.f32 %v1494_v9, %v1493_v7  ;;  %v1717_v29 = vmul.f32 %v2517_v26, %v1716_v31 }
 0x622   :  { %v1634_v33 = vadd.f32 %v1633_v14, %v1632_v18  ;;  %v1802_v38 = vmul.f32 %v2519_v21, %v1801_v32 }
 0x623   :  { %v1496_v41 = vpack.c.bf16 %v1495_v22, %v1495_v22  ;;  %v1719_v42 = vadd.f32 %v1718_v63, %v1717_v29 }
 0x624   :  { %v1635_v44 = vpack.c.bf16 %v1634_v33, %v1634_v33  ;;  %v1804_v45 = vadd.f32 %v1803_v39, %v1802_v38 }
 0x625   :  { %2296 = vmatmul.mubr.bf16.vlgmr.msra.gmra.mrb[44].mxu0 %v1496_v41  ;;  %v1720_v8 = vpack.c.bf16 %v1719_v42, %v1719_v42 }
 0x626   :  { %2316 = vmatmul.mubr.bf16.vlgmr.msra.gmra.mrb[44].mxu1 %v1635_v44  ;;  %2320 = vmatpush3.bf16.msra.mxu0 %v3269_v24 }
 0x627   :  { %2340 = vmatpush3.bf16.msra.mxu1 %v3269_v24  ;;  %2321 = vmatprep.subr.bf16.mxu0 %v3495_v25  ;;  %v1805_v24 = vpack.c.bf16 %v1804_v45, %v1804_v45 }
 0x628   :  { %2341 = vmatprep.subr.bf16.mxu1 %v3495_v25  ;;  %2335 = vmatprep.mubr.msk.bf16.mxu0 %vm2522_vm1, %v3495_v25 }
 0x629   :  { %2355 = vmatprep.mubr.msk.bf16.mxu1 %vm2522_vm1, %v3495_v25 }
 0x62a   :  { %2322 = vmatpush3.bf16.msra.mxu0 %v3278_v10 }
 0x62b   :  { %2342 = vmatpush3.bf16.msra.mxu1 %v3278_v10  ;;  %2323 = vmatprep.subr.bf16.mxu0 %v3495_v25  ;;  %v1935_v10 = vld [vmem:[%s3444_s11] ss:$0 sm:$0xff]  ;;  %s2528_s11 = smov 8  }
 0x62c   :  { %2343 = vmatprep.subr.bf16.mxu1 %v3495_v25 }
 0x62e   :  { %2324 = vmatpush3.bf16.msra.mxu0 %v3287_v11 }
 0x62f   :  { %2344 = vmatpush3.bf16.msra.mxu1 %v3287_v11  ;;  %2325 = vmatprep.subr.bf16.mxu0 %v3495_v25 }
 0x630   :  { %2345 = vmatprep.subr.bf16.mxu1 %v3495_v25 }
 0x632   :  { %2326 = vmatpush3.bf16.msra.mxu0 %v3296_v12 }
 0x633   :  { %2346 = vmatpush3.bf16.msra.mxu1 %v3296_v12  ;;  %2327 = vmatprep.subr.bf16.mxu0 %v3495_v25 }
 0x634   :  { %2347 = vmatprep.subr.bf16.mxu1 %v3495_v25 }
 0x636   :  { %2328 = vmatpush3.bf16.msra.mxu0 %v3303_v13 }
 0x637   :  { %2348 = vmatpush3.bf16.msra.mxu1 %v3303_v13  ;;  %2329 = vmatprep.subr.bf16.mxu0 %v3495_v25 }
 0x638   :  { %2349 = vmatprep.subr.bf16.mxu1 %v3495_v25 }
 0x63a   :  { %2330 = vmatpush3.bf16.msra.mxu0 %v3312_v15 }
 0x63b   :  { %2350 = vmatpush3.bf16.msra.mxu1 %v3312_v15  ;;  %2331 = vmatprep.subr.bf16.mxu0 %v3495_v25 }
 0x63c   :  { %2351 = vmatprep.subr.bf16.mxu1 %v3495_v25 }
 0x63e   :  { %2332 = vmatpush3.bf16.msra.mxu0 %v3321_v16 }
 0x63f   :  { %2352 = vmatpush3.bf16.msra.mxu1 %v3321_v16  ;;  %2333 = vmatprep.subr.bf16.mxu0 %v3495_v25 }
 0x640   :  { %2353 = vmatprep.subr.bf16.mxu1 %v3495_v25 }
 0x642   :  { %2334 = vmatpush3.bf16.msra.mxu0 %v3330_v23 }
 0x643   :  { %2354 = vmatpush3.bf16.msra.mxu1 %v3330_v23 }
 0x645   :  { %2336 = vmatmul.mubr.bf16.vlgmr.msra.gmra.mrb[48].mxu0 %v1720_v8 }
 0x646   :  { %2356 = vmatmul.mubr.bf16.vlgmr.msra.gmra.mrb[48].mxu1 %v1805_v24 }
 0x6f8   :  { %v1585_v11 = vpop.f32.mrb[44].mxu0 }
 0x6f9   :  { %v1586_v12 = vadd.f32 %v1935_v10, %v1585_v11  ;;  %v1670_v13 = vpop.f32.mrb[44].mxu1  ;;  %v2297_v15 = vpop.f32.mrb[45].mxu0 }
 0x6fa   :  { %v1671_v16 = vadd.f32 %v1935_v10, %v1670_v13  ;;  %v2317_v46 = vpop.f32.mrb[45].mxu1  ;;  %v1588_v47 = vpop.f32.mrb[46].mxu0 }
 0x6fb   :  { %v1673_v25 = vpop.f32.mrb[46].mxu1  ;;  %v2298_v48 = vpop.f32.mrb[47].mxu0 }
 0x6fc   :  { %1847 = vrot.lane.b32.xlu1 %v1671_v16, %s2527_s24  ;;  %v2318_v23 = vpop.f32.mrb[47].mxu1 }
 0x718   :  { %v1755_v49 = vpop.f32.mrb[48].mxu0 }
 0x719   :  { %v1756_v50 = vadd.f32 %v1935_v10, %v1755_v49  ;;  %v1840_v51 = vpop.f32.mrb[48].mxu1  ;;  %v2337_v52 = vpop.f32.mrb[49].mxu0 }
 0x71a   :  { %v1841_v53 = vadd.f32 %v1935_v10, %v1840_v51  ;;  %v2357_v54 = vpop.f32.mrb[49].mxu1  ;;  %v1758_v55 = vpop.f32.mrb[50].mxu0 }
 0x71b   :  { %v1843_v56 = vpop.f32.mrb[50].mxu1  ;;  %1851 = vrot.lane.b32.xlu0 %v1756_v50, %s2528_s11  ;;  %v2338_v62 = vpop.f32.mrb[51].mxu0 }
 0x71c   :  { %1855 = vrot.lane.b32.xlu1 %v1841_v53, %s2529_s25  ;;  %v2358_v57 = vpop.f32.mrb[51].mxu1 }
 0x76e   :  { %v1848_v17 = vpop.permute.xlu1 %1847 }
 0x76f   :  { %v1858_v58 = vsel %vm136_vm2, %v1586_v12, %v1848_v17 }
 0x78d   :  { %v1852_v59 = vpop.permute.xlu0 %1851 }
 0x78e   :  { %v1856_v19 = vpop.permute.xlu1 %1855  ;;  %v1860_v60 = vsel %vm1859_vm3, %v1858_v58, %v1852_v59 }
 0x78f   :  { %v1862_v40 = vsel %vm1861_vm4, %v1860_v60, %v1856_v19 }
 0x790   :  { %v1864_v61 = vsel %vm1863_vm5, %v1862_v40, 0.0 }
 0x791   :  { %1865 = vst [vmem:[%s3445_s12] sm:$0xff] %v1864_v61 }

</bundles_post_ra>
